<compile_context>
chip_gen: v7x
topology: tpu7x:2x2x1
jax: 0.10.0
libtpu: 0.0.40
codegen_flags: <defaults>
</compile_context>

<pallas_src>
import functools

import jax
import jax.numpy as jnp
from jax.experimental import pallas as pl
from jax.experimental.pallas import tpu as pltpu


NEG_SLOPE = 0.01  # nn.LeakyReLU() default negative_slope


def _leaky_relu(v):
    return jnp.where(v > 0, v, NEG_SLOPE * v)


def mlp_kernel(x_ref,
               w1_ref, b1_ref,
               w2_ref, b2_ref,
               w3_ref, b3_ref,
               w4_ref, b4_ref,
               w5_ref, b5_ref,
               o_ref):
    # Activations are [features, tile_b]: batch on the lane axis throughout.
    h = x_ref[...].astype(jnp.float32)                                            # [14,  tb]

    h = _leaky_relu(
        jnp.dot(w1_ref[...], h, preferred_element_type=jnp.float32) + b1_ref[...])  # [80, tb]
    h = _leaky_relu(
        jnp.dot(w2_ref[...], h, preferred_element_type=jnp.float32) + b2_ref[...])  # [80, tb]
    h = _leaky_relu(
        jnp.dot(w3_ref[...], h, preferred_element_type=jnp.float32) + b3_ref[...])  # [40, tb]
    h = _leaky_relu(
        jnp.dot(w4_ref[...], h, preferred_element_type=jnp.float32) + b4_ref[...])  # [20, tb]
    out = jnp.dot(w5_ref[...], h, preferred_element_type=jnp.float32) + b5_ref[...]  # [1,  tb]

    o_ref[...] = out.astype(o_ref.dtype)   # lane-dense (1, tile_b) store


@functools.partial(jax.jit, static_argnames=("tile_b",))
def network_noeq_forward(x, params, *, tile_b=2048):
    """x: [B, 14] float32. params: list of (W [out, in], b [out, 1])."""
    B, F = x.shape
    assert F == 14

    # Tile selection: multiple of 256 (fills MXU N tiles on v6e/v7x and is a
    # multiple of 128 for v5e), never larger than the padded batch itself.
    tile_b = pl.cdiv(tile_b, 256) * 256
    tb = min(tile_b, pl.cdiv(B, 256) * 256)
    n_tiles = pl.cdiv(B, tb)
    B_pad = n_tiles * tb

    if B_pad != B:
        x = jnp.pad(x, ((0, B_pad - B), (0, 0)))
    x_t = x.T  # [14, B_pad] — batch on lanes (fused with the pad under jit)

    (w1, b1), (w2, b2), (w3, b3), (w4, b4), (w5, b5) = params

    full_spec = lambda shape: pl.BlockSpec(shape, lambda i: (0, 0))

    in_specs = [
        pl.BlockSpec((14, tb), lambda i: (0, i)),
        full_spec(w1.shape), full_spec(b1.shape),
        full_spec(w2.shape), full_spec(b2.shape),
        full_spec(w3.shape), full_spec(b3.shape),
        full_spec(w4.shape), full_spec(b4.shape),
        full_spec(w5.shape), full_spec(b5.shape),
    ]
    out_specs = pl.BlockSpec((1, tb), lambda i: (0, i))

    out = pl.pallas_call(
        mlp_kernel,
        out_shape=jax.ShapeDtypeStruct((1, B_pad), jnp.float32),
        grid_spec=pltpu.PrefetchScalarGridSpec(
            num_scalar_prefetch=0,
            grid=(n_tiles,),
            in_specs=in_specs,
            out_specs=out_specs,
        ),
        compiler_params=pltpu.CompilerParams(
            dimension_semantics=("parallel",)),
    )(x_t, w1, b1, w2, b2, w3, b3, w4, b4, w5, b5)

    return out[0, :B].reshape(B, 1)


def init_params(key):
    """Deterministic synthetic init, PyTorch-Linear-style uniform bounds.

    Weights kept in PyTorch [out, in] layout; biases as [out, 1].
    """
    dims = [(14, 80), (80, 80), (80, 40), (40, 20), (20, 1)]
    params = []
    for i, (fan_in, fan_out) in enumerate(dims):
        kw, kb = jax.random.split(jax.random.fold_in(key, i))
        bound = 1.0 / (fan_in ** 0.5)
        w = jax.random.uniform(kw, (fan_out, fan_in), jnp.float32,
                               minval=-bound, maxval=bound)
        b = jax.random.uniform(kb, (fan_out, 1), jnp.float32,
                               minval=-bound, maxval=bound)
        params.append((w, b))
    return params


def reference_forward(x, params):
    h = x
    for i, (w, b) in enumerate(params):
        h = h @ w.T + b[:, 0]
        if i < len(params) - 1:
            h = jnp.where(h > 0, h, NEG_SLOPE * h)
    return h


if __name__ == "__main__":
    key = jax.random.PRNGKey(0)
    kx, kp = jax.random.split(key)

    B = 300  # deliberately not a multiple of the tile to exercise padding
    x = jax.random.normal(kx, (B, 14), jnp.float32)
    params = init_params(kp)

    out = network_noeq_forward(x, params, tile_b=2048)
    out = jax.block_until_ready(out)

    ref = reference_forward(x, params)
    assert out.shape == (B, 1)
    assert jnp.allclose(out, ref, atol=1e-4, rtol=1e-4), "mismatch vs reference"

    print("KERNEL_OK")
</pallas_src>

<mosaic_0001>
module attributes {stable_mosaic.version = 11 : i64} {
  func.func @mlp_kernel(%arg0: i32, %arg1: memref<14x512xf32, #tpu.memory_space<vmem>>, %arg2: memref<80x14xf32, #tpu.memory_space<vmem>>, %arg3: memref<80x1xf32, #tpu.memory_space<vmem>>, %arg4: memref<80x80xf32, #tpu.memory_space<vmem>>, %arg5: memref<80x1xf32, #tpu.memory_space<vmem>>, %arg6: memref<40x80xf32, #tpu.memory_space<vmem>>, %arg7: memref<40x1xf32, #tpu.memory_space<vmem>>, %arg8: memref<20x40xf32, #tpu.memory_space<vmem>>, %arg9: memref<20x1xf32, #tpu.memory_space<vmem>>, %arg10: memref<1x20xf32, #tpu.memory_space<vmem>>, %arg11: memref<1x1xf32, #tpu.memory_space<vmem>>, %arg12: memref<1x512xf32, #tpu.memory_space<vmem>>) attributes {dimension_semantics = [#tpu.dimension_semantics<parallel>], iteration_bounds = array<i64: 1>, scalar_prefetch = 0 : i64, scratch_operands = 0 : i64, tpu.core_type = #tpu.core_type<tc>, window_params = [{transform_indices = @transform_0, window_bounds = array<i64: 14, 512>}, {pipeline_mode = #tpu.pipeline_mode<synchronous>, transform_indices = @transform_1, window_bounds = array<i64: 80, 14>}, {pipeline_mode = #tpu.pipeline_mode<synchronous>, transform_indices = @transform_2, window_bounds = array<i64: 80, 1>}, {pipeline_mode = #tpu.pipeline_mode<synchronous>, transform_indices = @transform_3, window_bounds = array<i64: 80, 80>}, {pipeline_mode = #tpu.pipeline_mode<synchronous>, transform_indices = @transform_4, window_bounds = array<i64: 80, 1>}, {pipeline_mode = #tpu.pipeline_mode<synchronous>, transform_indices = @transform_5, window_bounds = array<i64: 40, 80>}, {pipeline_mode = #tpu.pipeline_mode<synchronous>, transform_indices = @transform_6, window_bounds = array<i64: 40, 1>}, {pipeline_mode = #tpu.pipeline_mode<synchronous>, transform_indices = @transform_7, window_bounds = array<i64: 20, 40>}, {pipeline_mode = #tpu.pipeline_mode<synchronous>, transform_indices = @transform_8, window_bounds = array<i64: 20, 1>}, {pipeline_mode = #tpu.pipeline_mode<synchronous>, transform_indices = @transform_9, window_bounds = array<i64: 1, 20>}, {pipeline_mode = #tpu.pipeline_mode<synchronous>, transform_indices = @transform_10, window_bounds = array<i64: 1, 1>}, {transform_indices = @transform_11, window_bounds = array<i64: 1, 512>}]} {
    %c0 = arith.constant 0 : index
    %c0_0 = arith.constant 0 : index
    %0 = vector.load %arg1[%c0, %c0_0] : memref<14x512xf32, #tpu.memory_space<vmem>>, vector<14x512xf32>
    %c0_1 = arith.constant 0 : index
    %c0_2 = arith.constant 0 : index
    %1 = vector.load %arg2[%c0_1, %c0_2] : memref<80x14xf32, #tpu.memory_space<vmem>>, vector<80x14xf32>
    %cst = arith.constant dense<0.000000e+00> : vector<80x512xf32>
    %2 = tpu.matmul %1, %0, %cst {dimension_numbers = #tpu.dot_dimension_numbers<[1], [0], [0], [1], [0, 0, 1, 1], [], []>} : vector<80x14xf32>, vector<14x512xf32>, vector<80x512xf32> -> vector<80x512xf32>
    %c0_3 = arith.constant 0 : index
    %c0_4 = arith.constant 0 : index
    %3 = vector.load %arg3[%c0_3, %c0_4] : memref<80x1xf32, #tpu.memory_space<vmem>>, vector<80x1xf32>
    %4 = vector.broadcast %3 : vector<80x1xf32> to vector<80x512xf32>
    %5 = arith.addf %2, %4 : vector<80x512xf32>
    %cst_5 = arith.constant 0.000000e+00 : f32
    %6 = vector.broadcast %cst_5 : f32 to vector<80x512xf32>
    %7 = arith.cmpf ogt, %5, %6 : vector<80x512xf32>
    %cst_6 = arith.constant 0.00999999977 : f32
    %8 = vector.broadcast %cst_6 : f32 to vector<80x512xf32>
    %9 = arith.mulf %8, %5 : vector<80x512xf32>
    %10 = arith.select %7, %5, %9 : vector<80x512xi1>, vector<80x512xf32>
    %c0_7 = arith.constant 0 : index
    %c0_8 = arith.constant 0 : index
    %11 = vector.load %arg4[%c0_7, %c0_8] : memref<80x80xf32, #tpu.memory_space<vmem>>, vector<80x80xf32>
    %cst_9 = arith.constant dense<0.000000e+00> : vector<80x512xf32>
    %12 = tpu.matmul %11, %10, %cst_9 {dimension_numbers = #tpu.dot_dimension_numbers<[1], [0], [0], [1], [0, 0, 1, 1], [], []>} : vector<80x80xf32>, vector<80x512xf32>, vector<80x512xf32> -> vector<80x512xf32>
    %c0_10 = arith.constant 0 : index
    %c0_11 = arith.constant 0 : index
    %13 = vector.load %arg5[%c0_10, %c0_11] : memref<80x1xf32, #tpu.memory_space<vmem>>, vector<80x1xf32>
    %14 = vector.broadcast %13 : vector<80x1xf32> to vector<80x512xf32>
    %15 = arith.addf %12, %14 : vector<80x512xf32>
    %cst_12 = arith.constant 0.000000e+00 : f32
    %16 = vector.broadcast %cst_12 : f32 to vector<80x512xf32>
    %17 = arith.cmpf ogt, %15, %16 : vector<80x512xf32>
    %cst_13 = arith.constant 0.00999999977 : f32
    %18 = vector.broadcast %cst_13 : f32 to vector<80x512xf32>
    %19 = arith.mulf %18, %15 : vector<80x512xf32>
    %20 = arith.select %17, %15, %19 : vector<80x512xi1>, vector<80x512xf32>
    %c0_14 = arith.constant 0 : index
    %c0_15 = arith.constant 0 : index
    %21 = vector.load %arg6[%c0_14, %c0_15] : memref<40x80xf32, #tpu.memory_space<vmem>>, vector<40x80xf32>
    %cst_16 = arith.constant dense<0.000000e+00> : vector<40x512xf32>
    %22 = tpu.matmul %21, %20, %cst_16 {dimension_numbers = #tpu.dot_dimension_numbers<[1], [0], [0], [1], [0, 0, 1, 1], [], []>} : vector<40x80xf32>, vector<80x512xf32>, vector<40x512xf32> -> vector<40x512xf32>
    %c0_17 = arith.constant 0 : index
    %c0_18 = arith.constant 0 : index
    %23 = vector.load %arg7[%c0_17, %c0_18] : memref<40x1xf32, #tpu.memory_space<vmem>>, vector<40x1xf32>
    %24 = vector.broadcast %23 : vector<40x1xf32> to vector<40x512xf32>
    %25 = arith.addf %22, %24 : vector<40x512xf32>
    %cst_19 = arith.constant 0.000000e+00 : f32
    %26 = vector.broadcast %cst_19 : f32 to vector<40x512xf32>
    %27 = arith.cmpf ogt, %25, %26 : vector<40x512xf32>
    %cst_20 = arith.constant 0.00999999977 : f32
    %28 = vector.broadcast %cst_20 : f32 to vector<40x512xf32>
    %29 = arith.mulf %28, %25 : vector<40x512xf32>
    %30 = arith.select %27, %25, %29 : vector<40x512xi1>, vector<40x512xf32>
    %c0_21 = arith.constant 0 : index
    %c0_22 = arith.constant 0 : index
    %31 = vector.load %arg8[%c0_21, %c0_22] : memref<20x40xf32, #tpu.memory_space<vmem>>, vector<20x40xf32>
    %cst_23 = arith.constant dense<0.000000e+00> : vector<20x512xf32>
    %32 = tpu.matmul %31, %30, %cst_23 {dimension_numbers = #tpu.dot_dimension_numbers<[1], [0], [0], [1], [0, 0, 1, 1], [], []>} : vector<20x40xf32>, vector<40x512xf32>, vector<20x512xf32> -> vector<20x512xf32>
    %c0_24 = arith.constant 0 : index
    %c0_25 = arith.constant 0 : index
    %33 = vector.load %arg9[%c0_24, %c0_25] : memref<20x1xf32, #tpu.memory_space<vmem>>, vector<20x1xf32>
    %34 = vector.broadcast %33 : vector<20x1xf32> to vector<20x512xf32>
    %35 = arith.addf %32, %34 : vector<20x512xf32>
    %cst_26 = arith.constant 0.000000e+00 : f32
    %36 = vector.broadcast %cst_26 : f32 to vector<20x512xf32>
    %37 = arith.cmpf ogt, %35, %36 : vector<20x512xf32>
    %cst_27 = arith.constant 0.00999999977 : f32
    %38 = vector.broadcast %cst_27 : f32 to vector<20x512xf32>
    %39 = arith.mulf %38, %35 : vector<20x512xf32>
    %40 = arith.select %37, %35, %39 : vector<20x512xi1>, vector<20x512xf32>
    %c0_28 = arith.constant 0 : index
    %c0_29 = arith.constant 0 : index
    %41 = vector.load %arg10[%c0_28, %c0_29] : memref<1x20xf32, #tpu.memory_space<vmem>>, vector<1x20xf32>
    %cst_30 = arith.constant dense<0.000000e+00> : vector<1x512xf32>
    %42 = tpu.matmul %41, %40, %cst_30 {dimension_numbers = #tpu.dot_dimension_numbers<[1], [0], [0], [1], [0, 0, 1, 1], [], []>} : vector<1x20xf32>, vector<20x512xf32>, vector<1x512xf32> -> vector<1x512xf32>
    %c0_31 = arith.constant 0 : index
    %c0_32 = arith.constant 0 : index
    %43 = vector.load %arg11[%c0_31, %c0_32] : memref<1x1xf32, #tpu.memory_space<vmem>>, vector<1x1xf32>
    %44 = vector.broadcast %43 : vector<1x1xf32> to vector<1x512xf32>
    %45 = arith.addf %42, %44 : vector<1x512xf32>
    %c0_33 = arith.constant 0 : index
    %c0_34 = arith.constant 0 : index
    %46 = vector.load %arg12[%c0_33, %c0_34] : memref<1x512xf32, #tpu.memory_space<vmem>>, vector<1x512xf32>
    tpu.vector_store %arg12[%c0_33, %c0_34], %45 {strides = array<i32>} : memref<1x512xf32, #tpu.memory_space<vmem>>, vector<1x512xf32>,
    return
  }
  func.func @transform_0(%arg0: i32) -> (i32, i32) {
    %c0_i32 = arith.constant 0 : i32
    %c0_i32_0 = arith.constant 0 : i32
    return %c0_i32, %arg0 : i32, i32
  }
  func.func @transform_1(%arg0: i32) -> (i32, i32) {
    %c0_i32 = arith.constant 0 : i32
    %c0_i32_0 = arith.constant 0 : i32
    %c0_i32_1 = arith.constant 0 : i32
    return %c0_i32, %c0_i32_0 : i32, i32
  }
  func.func @transform_2(%arg0: i32) -> (i32, i32) {
    %c0_i32 = arith.constant 0 : i32
    %c0_i32_0 = arith.constant 0 : i32
    %c0_i32_1 = arith.constant 0 : i32
    return %c0_i32, %c0_i32_0 : i32, i32
  }
  func.func @transform_3(%arg0: i32) -> (i32, i32) {
    %c0_i32 = arith.constant 0 : i32
    %c0_i32_0 = arith.constant 0 : i32
    %c0_i32_1 = arith.constant 0 : i32
    return %c0_i32, %c0_i32_0 : i32, i32
  }
  func.func @transform_4(%arg0: i32) -> (i32, i32) {
    %c0_i32 = arith.constant 0 : i32
    %c0_i32_0 = arith.constant 0 : i32
    %c0_i32_1 = arith.constant 0 : i32
    return %c0_i32, %c0_i32_0 : i32, i32
  }
  func.func @transform_5(%arg0: i32) -> (i32, i32) {
    %c0_i32 = arith.constant 0 : i32
    %c0_i32_0 = arith.constant 0 : i32
    %c0_i32_1 = arith.constant 0 : i32
    return %c0_i32, %c0_i32_0 : i32, i32
  }
  func.func @transform_6(%arg0: i32) -> (i32, i32) {
    %c0_i32 = arith.constant 0 : i32
    %c0_i32_0 = arith.constant 0 : i32
    %c0_i32_1 = arith.constant 0 : i32
    return %c0_i32, %c0_i32_0 : i32, i32
  }
  func.func @transform_7(%arg0: i32) -> (i32, i32) {
    %c0_i32 = arith.constant 0 : i32
    %c0_i32_0 = arith.constant 0 : i32
    %c0_i32_1 = arith.constant 0 : i32
    return %c0_i32, %c0_i32_0 : i32, i32
  }
  func.func @transform_8(%arg0: i32) -> (i32, i32) {
    %c0_i32 = arith.constant 0 : i32
    %c0_i32_0 = arith.constant 0 : i32
    %c0_i32_1 = arith.constant 0 : i32
    return %c0_i32, %c0_i32_0 : i32, i32
  }
  func.func @transform_9(%arg0: i32) -> (i32, i32) {
    %c0_i32 = arith.constant 0 : i32
    %c0_i32_0 = arith.constant 0 : i32
    %c0_i32_1 = arith.constant 0 : i32
    return %c0_i32, %c0_i32_0 : i32, i32
  }
  func.func @transform_10(%arg0: i32) -> (i32, i32) {
    %c0_i32 = arith.constant 0 : i32
    %c0_i32_0 = arith.constant 0 : i32
    %c0_i32_1 = arith.constant 0 : i32
    return %c0_i32, %c0_i32_0 : i32, i32
  }
  func.func @transform_11(%arg0: i32) -> (i32, i32) {
    %c0_i32 = arith.constant 0 : i32
    %c0_i32_0 = arith.constant 0 : i32
    return %c0_i32, %arg0 : i32, i32
  }
}

</mosaic_0001>

<bundles_post_ra>
// kernel: network_noeq_forward.1
= control target key start
LH: loop header
LB: loop body
LE: loop exit
PB: predicated region body
PF: predicated region fallthrough
CT: control target
= control target key end

     0   :  { %vm149_vm0 = vcmask 1045504   ;;  %vm1932_vm1 = vmmov 1   ;;  %v1933_v3 = vmov 0.0   ;;  %v1934_v9 = vmov 0   ;;  %s2571_s0 = inlined_call_operand.vmem [shape: f32[14,512], index: 0, kind: input, shape index: {}]   ;;  %s2572_s10 = inlined_call_operand.<no memory space> [shape: f32[1,1], index: 10, kind: input, shape index: {}]   ;;  %s2573_s1 = inlined_call_operand.vmem [shape: f32[80,14], index: 1, kind: input, shape index: {}]   ;;  %s2574_s2 = inlined_call_operand.vmem [shape: f32[80,1], index: 2, kind: input, shape index: {}]   ;;  %s2575_s4 = inlined_call_operand.vmem [shape: f32[80,1], index: 4, kind: input, shape index: {}]   ;;  %s2576_s6 = inlined_call_operand.vmem [shape: f32[40,1], index: 6, kind: input, shape index: {}]   ;;  %s2577_s8 = inlined_call_operand.vmem [shape: f32[20,1], index: 8, kind: input, shape index: {}]   ;;  %s2578_s3 = inlined_call_operand.vmem [shape: f32[80,80], index: 3, kind: input, shape index: {}]   ;;  %s2579_s5 = inlined_call_operand.vmem [shape: f32[40,80], index: 5, kind: input, shape index: {}]   ;;  %s2580_s7 = inlined_call_operand.vmem [shape: f32[20,40], index: 7, kind: input, shape index: {}]   ;;  %s2581_s9 = inlined_call_operand.vmem [shape: f32[1,20], index: 9, kind: input, shape index: {}]   ;;  %s2582_s11 = inlined_call_operand.vmem [shape: f32[1,512], index: 11, kind: output, shape index: {}]  }
   0x1   :  { %v41_v0 = vld [vmem:[%s2571_s0 + $0x8] sm:$0xff]  ;;  %vm2002_vm2 = vmpackc.low %vm149_vm0, %vm1932_vm1  ;;  %226 = vmatprep.mubr.f32.mxu0 %v1933_v3  ;;  %351 = vmatprep.mubr.f32.mxu1 %v1933_v3  ;;  %v16_v4 = vstv %s2572_s10  ;;  %v43_v6 = vld [vmem:[%s2571_s0 + $0x18] sm:$0xff]  ;;  %vm118_vm3 = vcmask 113664  }
   0x2   :  { %v45_v1 = vld [vmem:[%s2571_s0 + $0x28] sm:$0x3f]  ;;  %v47_v7 = vld [vmem:[%s2571_s0 + $0x38] sm:$0x3f]  ;;  %v40_v8 = vld [vmem:[%s2571_s0] sm:$0xff]  ;;  %1930 = vset.pattern.permute.xlu0 %v1934_v9  ;;  %1931 = vset.pattern.permute.xlu1 %v1934_v9 }
   0x3   :  { %v1810_v5 = vpack.c.bf16 %v45_v1, %v41_v0  ;;  %17 = vst [vmem:[#allocation2] sm:$0x1] %v16_v4  ;;  %v1816_v10 = vpack.c.bf16 %v47_v7, %v43_v6  ;;  %v44_v11 = vld [vmem:[%s2571_s0 + $0x20] sm:$0x3f]  ;;  %v42_v12 = vld [vmem:[%s2571_s0 + $0x10] sm:$0xff]  ;;  %v59_v18 = vld [vmem:[%s2574_s2 + $0x8] sm:$0xff] }
   0x4   :  { %v46_v13 = vld [vmem:[%s2571_s0 + $0x30] sm:$0x3f]  ;;  %v1813_v14 = vpack.c.bf16 %v44_v11, %v40_v8  ;;  %v48_v16 = vld [vmem:[%s2573_s1] sm:$0xff]  ;;  %v49_v20 = vld [vmem:[%s2573_s1 + $0x8] sm:$0xff] }
   0x5   :  { %1812 = vmatprep.subr.msk.bf16.mxu0 %vm2002_vm2, %v1810_v5  ;;  %v1819_v15 = vpack.c.bf16 %v46_v13, %v42_v12  ;;  %1818 = vmatprep.subr.msk.bf16.mxu1 %vm2002_vm2, %v1816_v10  ;;  %v58_v17 = vld [vmem:[%s2574_s2] sm:$0xff]  ;;  %v60_v19 = vld [vmem:[%s2574_s2 + $0x10] sm:$0xff]  ;;  %v61_v22 = vld [vmem:[%s2574_s2 + $0x18] sm:$0xff] }
   0x6   :  { %1815 = vmatpush1.bf16.msk.msra.mxu0 %vm2002_vm2, %v1813_v14  ;;  %70 = vperm.xlu0 %1930, %v58_v17   ;;  %v62_v21 = vld [vmem:[%s2574_s2 + $0x20] sm:$0xff]  ;;  %v50_v23 = vld [vmem:[%s2573_s1 + $0x10] sm:$0xff]  ;;  %v63_v25 = vld [vmem:[%s2574_s2 + $0x28] sm:$0xff] }
   0x7   :  { %1821 = vmatpush1.bf16.msk.msra.mxu1 %vm2002_vm2, %v1819_v15  ;;  %80 = vperm.xlu1 %1931, %v60_v19   ;;  %v64_v24 = vld [vmem:[%s2574_s2 + $0x30] sm:$0xff]  ;;  %v51_v26 = vld [vmem:[%s2573_s1 + $0x18] sm:$0xff]  ;;  %v66_v27 = vld [vmem:[%s2574_s2 + $0x40] sm:$0xff] }
   0x8   :  { %v65_v28 = vld [vmem:[%s2574_s2 + $0x38] sm:$0xff]  ;;  %v52_v29 = vld [vmem:[%s2573_s1 + $0x20] sm:$0xff]  ;;  %v67_v31 = vld [vmem:[%s2574_s2 + $0x48] sm:$0xff] }
   0x9   :  { %1746 = vmatmul.mubr.msk.f32.vlgmr.msra.gmra.mrb[0].mxu0 %vm118_vm3, %v48_v16  ;;  %v542_v30 = vld [vmem:[%s2575_s4] sm:$0xff]  ;;  %v53_v32 = vld [vmem:[%s2573_s1 + $0x28] sm:$0xff]  ;;  %v544_v33 = vld [vmem:[%s2575_s4 + $0x10] sm:$0xff] }
   0xa   :  { %1758 = vmatmul.mubr.msk.f32.vlgmr.msra.gmra.mrb[0].mxu1 %vm118_vm3, %v48_v16  ;;  %232 = vmatprep.mubr.f32.mxu0 %v1933_v3  ;;  %v543_v34 = vld [vmem:[%s2575_s4 + $0x8] sm:$0xff]  ;;  %v54_v35 = vld [vmem:[%s2573_s1 + $0x30] sm:$0xff]  ;;  %v546_v36 = vld [vmem:[%s2575_s4 + $0x20] sm:$0xff] }
   0xb   :  { %357 = vmatprep.mubr.f32.mxu1 %v1933_v3  ;;  %75 = vperm.xlu0 %1930, %v59_v18   ;;  %v545_v37 = vld [vmem:[%s2575_s4 + $0x18] sm:$0xff]  ;;  %v548_v39 = vld [vmem:[%s2575_s4 + $0x30] sm:$0xff]  ;;  %v547_v40 = vld [vmem:[%s2575_s4 + $0x28] sm:$0xff] }
   0xc   :  { %85 = vperm.xlu1 %1931, %v61_v22   ;;  %v55_v38 = vld [vmem:[%s2573_s1 + $0x38] sm:$0xff]  ;;  %v56_v41 = vld [vmem:[%s2573_s1 + $0x40] sm:$0xff]  ;;  %v57_v44 = vld [vmem:[%s2573_s1 + $0x48] sm:$0xff] }
   0xd   :  { %1747 = vmatmul.mubr.msk.f32.gmra.mrb[2].mxu0 %vm118_vm3, %v49_v20  ;;  %v550_v42 = vld [vmem:[%s2575_s4 + $0x40] sm:$0xff]  ;;  %v549_v43 = vld [vmem:[%s2575_s4 + $0x38] sm:$0xff]  ;;  %v551_v46 = vld [vmem:[%s2575_s4 + $0x48] sm:$0xff] }
   0xe   :  { %1759 = vmatmul.mubr.msk.f32.gmra.mrb[2].mxu1 %vm118_vm3, %v49_v20  ;;  %238 = vmatprep.mubr.f32.mxu0 %v1933_v3  ;;  %v1008_v45 = vld [vmem:[%s2576_s6] sm:$0xff]  ;;  %v1010_v47 = vld [vmem:[%s2576_s6 + $0x10] sm:$0xff]  ;;  %v1009_v48 = vld [vmem:[%s2576_s6 + $0x8] sm:$0xff] }
   0xf   :  { %363 = vmatprep.mubr.f32.mxu1 %v1933_v3  ;;  %90 = vperm.xlu0 %1930, %v62_v21   ;;  %v1012_v49 = vld [vmem:[%s2576_s6 + $0x20] sm:$0xff]  ;;  %v1011_v50 = vld [vmem:[%s2576_s6 + $0x18] sm:$0xff]  ;;  %v1307_v51 = vld [vmem:[%s2577_s8 + $0x8] sm:$0xff] }
  0x10   :  { %95 = vperm.xlu1 %1931, %v63_v25   ;;  %v1306_v52 = vld [vmem:[%s2577_s8] sm:$0xff]  ;;  %v1308_v54 = vld [vmem:[%s2577_s8 + $0x10] sm:$0xf] }
  0x11   :  { %1748 = vmatmul.mubr.msk.f32.gmra.mrb[4].mxu0 %vm118_vm3, %v50_v23  ;;  %v1537_v53 = vld [vmem:[#allocation2] sm:$0x1] }
  0x12   :  { %1760 = vmatmul.mubr.msk.f32.gmra.mrb[4].mxu1 %vm118_vm3, %v50_v23  ;;  %244 = vmatprep.mubr.f32.mxu0 %v1933_v3 }
  0x13   :  { %369 = vmatprep.mubr.f32.mxu1 %v1933_v3  ;;  %100 = vperm.xlu0 %1930, %v64_v24  }
  0x14   :  { %105 = vperm.xlu1 %1931, %v65_v28  }
  0x15   :  { %1749 = vmatmul.mubr.msk.f32.gmra.mrb[6].mxu0 %vm118_vm3, %v51_v26 }
  0x16   :  { %1761 = vmatmul.mubr.msk.f32.gmra.mrb[6].mxu1 %vm118_vm3, %v51_v26  ;;  %250 = vmatprep.mubr.f32.mxu0 %v1933_v3 }
  0x17   :  { %375 = vmatprep.mubr.f32.mxu1 %v1933_v3  ;;  %110 = vperm.xlu0 %1930, %v66_v27  }
  0x18   :  { %115 = vperm.xlu1 %1931, %v67_v31  }
  0x19   :  { %1750 = vmatmul.mubr.msk.f32.gmra.mrb[8].mxu0 %vm118_vm3, %v52_v29 }
  0x1a   :  { %1762 = vmatmul.mubr.msk.f32.gmra.mrb[8].mxu1 %vm118_vm3, %v52_v29  ;;  %256 = vmatprep.mubr.f32.mxu0 %v1933_v3 }
  0x1b   :  { %381 = vmatprep.mubr.f32.mxu1 %v1933_v3  ;;  %554 = vperm.xlu0 %1930, %v542_v30  }
  0x1c   :  { %559 = vperm.xlu1 %1931, %v543_v34  }
  0x1d   :  { %1751 = vmatmul.mubr.msk.f32.gmra.mrb[10].mxu0 %vm118_vm3, %v53_v32 }
  0x1e   :  { %1763 = vmatmul.mubr.msk.f32.gmra.mrb[10].mxu1 %vm118_vm3, %v53_v32  ;;  %262 = vmatprep.mubr.f32.mxu0 %v1933_v3 }
  0x1f   :  { %387 = vmatprep.mubr.f32.mxu1 %v1933_v3  ;;  %564 = vperm.xlu0 %1930, %v544_v33  }
  0x20   :  { %569 = vperm.xlu1 %1931, %v545_v37  }
  0x21   :  { %1752 = vmatmul.mubr.msk.f32.gmra.mrb[12].mxu0 %vm118_vm3, %v54_v35 }
  0x22   :  { %1764 = vmatmul.mubr.msk.f32.gmra.mrb[12].mxu1 %vm118_vm3, %v54_v35  ;;  %268 = vmatprep.mubr.f32.mxu0 %v1933_v3 }
  0x23   :  { %393 = vmatprep.mubr.f32.mxu1 %v1933_v3  ;;  %574 = vperm.xlu0 %1930, %v546_v36  }
  0x24   :  { %579 = vperm.xlu1 %1931, %v547_v40  }
  0x25   :  { %1753 = vmatmul.mubr.msk.f32.gmra.mrb[14].mxu0 %vm118_vm3, %v55_v38 }
  0x26   :  { %1765 = vmatmul.mubr.msk.f32.gmra.mrb[14].mxu1 %vm118_vm3, %v55_v38  ;;  %274 = vmatprep.mubr.f32.mxu0 %v1933_v3 }
  0x27   :  { %399 = vmatprep.mubr.f32.mxu1 %v1933_v3  ;;  %584 = vperm.xlu0 %1930, %v548_v39  }
  0x28   :  { %589 = vperm.xlu1 %1931, %v549_v43  }
  0x29   :  { %1754 = vmatmul.mubr.msk.f32.gmra.mrb[16].mxu0 %vm118_vm3, %v56_v41 }
  0x2a   :  { %1766 = vmatmul.mubr.msk.f32.gmra.mrb[16].mxu1 %vm118_vm3, %v56_v41  ;;  %280 = vmatprep.mubr.f32.mxu0 %v1933_v3 }
  0x2b   :  { %405 = vmatprep.mubr.f32.mxu1 %v1933_v3  ;;  %594 = vperm.xlu0 %1930, %v550_v42  }
  0x2c   :  { %599 = vperm.xlu1 %1931, %v551_v46  }
  0x2d   :  { %1755 = vmatmul.mubr.msk.f32.gmra.mrb[18].mxu0 %vm118_vm3, %v57_v44 }
  0x2e   :  { %1767 = vmatmul.mubr.msk.f32.gmra.mrb[18].mxu1 %vm118_vm3, %v57_v44  ;;  %697 = vmatprep.mubr.f32.mxu0 %v1933_v3 }
  0x2f   :  { %822 = vmatprep.mubr.f32.mxu1 %v1933_v3  ;;  %1015 = vperm.xlu0 %1930, %v1008_v45  }
  0x30   :  { %1020 = vperm.xlu1 %1931, %v1009_v48  }
  0x33   :  { %1025 = vperm.xlu0 %1930, %v1010_v47  }
  0x34   :  { %1030 = vperm.xlu1 %1931, %v1011_v50  }
  0x37   :  { %1035 = vperm.xlu0 %1930, %v1012_v49  }
  0x38   :  { %1311 = vperm.xlu1 %1931, %v1306_v52  }
  0x3b   :  { %1316 = vperm.xlu0 %1930, %v1307_v51  }
  0x3c   :  { %1321 = vperm.xlu1 %1931, %v1308_v54  }
  0x3f   :  { %1540 = vperm.xlu0 %1930, %v1537_v53  }
  0x85   :  { %v71_v55 = vpop.permute.xlu0 %70 }
  0x86   :  { %v81_v63 = vpop.permute.xlu1 %80 }
  0x8a   :  { %v76_v1 = vpop.permute.xlu0 %75 }
  0x8b   :  { %v86_v17 = vpop.permute.xlu1 %85 }
  0xdc   :  { %v228_v56 = vpop.f32.mrb[0].mxu0 }
  0xdd   :  { %v353_v57 = vpop.f32.mrb[0].mxu1  ;;  %v229_v58 = vadd.f32 %v228_v56, %v71_v55  ;;  %v230_v60 = vpop.f32.mrb[1].mxu0 }
  0xde   :  { %v354_v59 = vadd.f32 %v353_v57, %v71_v55  ;;  %v355_v61 = vpop.f32.mrb[1].mxu1  ;;  %v231_v62 = vadd.f32 %v230_v60, %v71_v55  ;;  %v96_v56 = vpop.permute.xlu1 %95 }
  0xdf   :  { %v356_v0 = vadd.f32 %v355_v61, %v71_v55  ;;  %v452_v2 = vmul.f32 0.01, %v229_v58  ;;  %vm412_vm4 = vcmp.gt.f32.partialorder %v229_v58, 0.0  ;;  %v91_v55 = vpop.permute.xlu0 %90 }
  0xe0   :  { %vm414_vm5 = vcmp.gt.f32.partialorder %v354_v59, 0.0  ;;  %v454_v4 = vmul.f32 0.01, %v354_v59  ;;  %v234_v5 = vpop.f32.mrb[2].mxu0  ;;  %vm413_vm6 = vcmp.gt.f32.partialorder %v231_v62, 0.0 }
  0xe1   :  { %v359_v6 = vpop.f32.mrb[2].mxu1  ;;  %v453_v7 = vmul.f32 0.01, %v231_v62  ;;  %v235_v8 = vadd.f32 %v234_v5, %v76_v1  ;;  %v236_v10 = vpop.f32.mrb[3].mxu0  ;;  %vm415_vm7 = vcmp.gt.f32.partialorder %v356_v0, 0.0  ;;  %v492_v18 = vsel %vm412_vm4, %v229_v58, %v452_v2 }
  0xe2   :  { %v360_v9 = vadd.f32 %v359_v6, %v76_v1  ;;  %v361_v11 = vpop.f32.mrb[3].mxu1  ;;  %v455_v12 = vmul.f32 0.01, %v356_v0  ;;  %v237_v13 = vadd.f32 %v236_v10, %v76_v1  ;;  %v494_v19 = vsel %vm414_vm5, %v354_v59, %v454_v4 }
  0xe3   :  { %v362_v14 = vadd.f32 %v361_v11, %v76_v1  ;;  %vm416_vm8 = vcmp.gt.f32.partialorder %v235_v8, 0.0  ;;  %v456_v15 = vmul.f32 0.01, %v235_v8  ;;  %v493_v36 = vsel %vm413_vm6, %v231_v62, %v453_v7 }
  0xe4   :  { %vm418_vm9 = vcmp.gt.f32.partialorder %v360_v9, 0.0  ;;  %v458_v16 = vmul.f32 0.01, %v360_v9  ;;  %v457_v20 = vmul.f32 0.01, %v237_v13  ;;  %vm417_vm10 = vcmp.gt.f32.partialorder %v237_v13, 0.0 }
  0xe5   :  { %v459_v21 = vmul.f32 0.01, %v362_v14  ;;  %v496_v22 = vsel %vm416_vm8, %v235_v8, %v456_v15  ;;  %vm419_vm11 = vcmp.gt.f32.partialorder %v362_v14, 0.0  ;;  %v240_v24 = vpop.f32.mrb[4].mxu0  ;;  %v365_v25 = vpop.f32.mrb[4].mxu1  ;;  %v495_v38 = vsel %vm415_vm7, %v356_v0, %v455_v12 }
  0xe6   :  { %v498_v23 = vsel %vm418_vm9, %v360_v9, %v458_v16  ;;  %v1824_v26 = vpack.c.bf16 %v496_v22, %v492_v18  ;;  %v241_v28 = vadd.f32 %v240_v24, %v81_v63  ;;  %v366_v29 = vadd.f32 %v365_v25, %v81_v63  ;;  %v242_v30 = vpop.f32.mrb[5].mxu0  ;;  %v367_v31 = vpop.f32.mrb[5].mxu1 }
  0xe7   :  { %v1844_v27 = vpack.c.bf16 %v498_v23, %v494_v19  ;;  %v2193_v32 = vadd.f32 %v242_v30, %v81_v63  ;;  %v2195_v33 = vadd.f32 %v367_v31, %v81_v63  ;;  %v497_v37 = vsel %vm417_vm10, %v237_v13, %v457_v20 }
  0xe8   :  { %v246_v34 = vpop.f32.mrb[6].mxu0  ;;  %v499_v39 = vsel %vm419_vm11, %v362_v14, %v459_v21  ;;  %vm420_vm12 = vcmp.gt.f32.partialorder %v241_v28, 0.0  ;;  %v460_v40 = vmul.f32 0.01, %v241_v28  ;;  %vm422_vm13 = vcmp.gt.f32.partialorder %v366_v29, 0.0 }
  0xe9   :  { %v371_v35 = vpop.f32.mrb[6].mxu1  ;;  %v462_v41 = vmul.f32 0.01, %v366_v29  ;;  %vm421_vm14 = vcmp.gt.f32.partialorder %v2193_v32, 0.0  ;;  %v2202_v42 = vmul.f32 0.01, %v2193_v32  ;;  %v247_v43 = vadd.f32 %v246_v34, %v86_v17  ;;  %v101_v34 = vpop.permute.xlu0 %100 }
  0xea   :  { %v372_v44 = vadd.f32 %v371_v35, %v86_v17  ;;  %v248_v45 = vpop.f32.mrb[7].mxu0  ;;  %v373_v46 = vpop.f32.mrb[7].mxu1  ;;  %vm423_vm15 = vcmp.gt.f32.partialorder %v2195_v33, 0.0  ;;  %v2206_v47 = vmul.f32 0.01, %v2195_v33  ;;  %v1822_v49 = vpack.c.bf16 %v497_v37, %v493_v36 }
  0xeb   :  { %v249_v48 = vadd.f32 %v248_v45, %v86_v17  ;;  %v1842_v50 = vpack.c.bf16 %v499_v39, %v495_v38  ;;  %vm424_vm0 = vcmp.gt.f32.partialorder %v247_v43, 0.0  ;;  %v464_v53 = vmul.f32 0.01, %v247_v43  ;;  %v106_v35 = vpop.permute.xlu1 %105 }
  0xec   :  { %v252_v51 = vpop.f32.mrb[8].mxu0  ;;  %vm426_vm1 = vcmp.gt.f32.partialorder %v372_v44, 0.0  ;;  %v466_v54 = vmul.f32 0.01, %v372_v44  ;;  %v2209_v57 = vsel %vm420_vm12, %v241_v28, %v460_v40  ;;  %v2212_v58 = vsel %vm422_vm13, %v366_v29, %v462_v41  ;;  %1823 = vmatprep.subr.bf16.mxu0 %v1822_v49 }
  0xed   :  { %v377_v52 = vpop.f32.mrb[8].mxu1  ;;  %vm425_vm2 = vcmp.gt.f32.partialorder %v249_v48, 0.0  ;;  %v374_v59 = vadd.f32 %v373_v46, %v86_v17  ;;  %1843 = vmatprep.subr.bf16.mxu1 %v1842_v50  ;;  %v2214_v60 = vsel %vm424_vm0, %v247_v43, %v464_v53  ;;  %v465_v62 = vmul.f32 0.01, %v249_v48  ;;  %1825 = vmatpush1.bf16.msra.mxu0 %v1824_v26  ;;  %v254_v0 = vpop.f32.mrb[9].mxu0 }
  0xee   :  { %v2216_v61 = vsel %vm426_vm1, %v372_v44, %v466_v54  ;;  %1845 = vmatpush1.bf16.msra.mxu1 %v1844_v27  ;;  %v253_v63 = vadd.f32 %v252_v51, %v91_v55  ;;  %v379_v1 = vpop.f32.mrb[9].mxu1  ;;  %v1828_v2 = vpack.c.bf16 %v2214_v60, %v2209_v57  ;;  %v378_v5 = vadd.f32 %v377_v52, %v91_v55 }
  0xef   :  { %v1848_v4 = vpack.c.bf16 %v2216_v61, %v2212_v58  ;;  %v2222_v6 = vadd.f32 %v254_v0, %v91_v55  ;;  %v2224_v10 = vadd.f32 %v379_v1, %v91_v55  ;;  %vm427_vm4 = vcmp.gt.f32.partialorder %v374_v59, 0.0 }
  0xf0   :  { %v258_v7 = vpop.f32.mrb[10].mxu0  ;;  %vm428_vm3 = vcmp.gt.f32.partialorder %v253_v63, 0.0  ;;  %v468_v9 = vmul.f32 0.01, %v253_v63  ;;  %v467_v14 = vmul.f32 0.01, %v374_v59  ;;  %v505_v26 = vsel %vm425_vm2, %v249_v48, %v465_v62 }
  0xf1   :  { %v383_v8 = vpop.f32.mrb[10].mxu1  ;;  %v259_v11 = vadd.f32 %v258_v7, %v96_v56  ;;  %v260_v12 = vpop.f32.mrb[11].mxu0  ;;  %vm430_vm5 = vcmp.gt.f32.partialorder %v378_v5, 0.0  ;;  %v470_v15 = vmul.f32 0.01, %v378_v5  ;;  %vm429_vm6 = vcmp.gt.f32.partialorder %v2222_v6, 0.0 }
  0xf2   :  { %v385_v13 = vpop.f32.mrb[11].mxu1  ;;  %v2226_v16 = vsel %vm428_vm3, %v253_v63, %v468_v9  ;;  %v2230_v17 = vmul.f32 0.01, %v2222_v6  ;;  %vm431_vm8 = vcmp.gt.f32.partialorder %v2224_v10, 0.0  ;;  %v384_v19 = vadd.f32 %v383_v8, %v96_v56  ;;  %v111_v9 = vpop.permute.xlu0 %110 }
  0xf3   :  { %vm432_vm7 = vcmp.gt.f32.partialorder %v259_v11, 0.0  ;;  %v472_v18 = vmul.f32 0.01, %v259_v11  ;;  %v261_v20 = vadd.f32 %v260_v12, %v96_v56  ;;  %v2233_v23 = vsel %vm430_vm5, %v378_v5, %v470_v15 }
  0xf4   :  { %v264_v21 = vpop.f32.mrb[12].mxu0  ;;  %v471_v24 = vmul.f32 0.01, %v2224_v10  ;;  %v2236_v25 = vadd.f32 %v385_v13, %v96_v56  ;;  %vm434_vm9 = vcmp.gt.f32.partialorder %v384_v19, 0.0  ;;  %v474_v30 = vmul.f32 0.01, %v384_v19 }
  0xf5   :  { %v389_v22 = vpop.f32.mrb[12].mxu1  ;;  %v266_v27 = vpop.f32.mrb[13].mxu0  ;;  %v2239_v29 = vsel %vm432_vm7, %v259_v11, %v472_v18  ;;  %v501_v31 = vsel %vm421_vm14, %v2193_v32, %v2202_v42  ;;  %vm433_vm10 = vcmp.gt.f32.partialorder %v261_v20, 0.0  ;;  %v473_v37 = vmul.f32 0.01, %v261_v20 }
  0xf6   :  { %v391_v28 = vpop.f32.mrb[13].mxu1  ;;  %v1832_v36 = vpack.c.bf16 %v2239_v29, %v2226_v16  ;;  %v503_v38 = vsel %vm423_vm15, %v2195_v33, %v2206_v47  ;;  %v2251_v39 = vsel %vm434_vm9, %v384_v19, %v474_v30  ;;  %v1826_v40 = vpack.c.bf16 %v505_v26, %v501_v31 }
  0xf7   :  { %v507_v41 = vsel %vm427_vm4, %v374_v59, %v467_v14  ;;  %v265_v43 = vadd.f32 %v264_v21, %v101_v34  ;;  %v1852_v42 = vpack.c.bf16 %v2251_v39, %v2233_v23  ;;  %v390_v46 = vadd.f32 %v389_v22, %v101_v34 }
  0xf8   :  { %v270_v44 = vpop.f32.mrb[14].mxu0  ;;  %v1846_v45 = vpack.c.bf16 %v507_v41, %v503_v38  ;;  %v2256_v48 = vadd.f32 %v266_v27, %v101_v34  ;;  %1827 = vmatprep.subr.bf16.mxu0 %v1826_v40  ;;  %v2258_v47 = vadd.f32 %v391_v28, %v101_v34  ;;  %vm435_vm12 = vcmp.gt.f32.partialorder %v2236_v25, 0.0 }
  0xf9   :  { %v395_v32 = vpop.f32.mrb[14].mxu1  ;;  %v272_v49 = vpop.f32.mrb[15].mxu0  ;;  %vm436_vm11 = vcmp.gt.f32.partialorder %v265_v43, 0.0  ;;  %v476_v33 = vmul.f32 0.01, %v265_v43  ;;  %v271_v51 = vadd.f32 %v270_v44, %v106_v35  ;;  %1829 = vmatpush1.bf16.msra.mxu0 %v1828_v2  ;;  %vm438_vm13 = vcmp.gt.f32.partialorder %v390_v46, 0.0 }
  0xfa   :  { %v397_v50 = vpop.f32.mrb[15].mxu1  ;;  %v475_v52 = vmul.f32 0.01, %v2236_v25  ;;  %1847 = vmatprep.subr.bf16.mxu1 %v1846_v45  ;;  %v478_v53 = vmul.f32 0.01, %v390_v46  ;;  %vm437_vm14 = vcmp.gt.f32.partialorder %v2256_v48, 0.0  ;;  %v396_v62 = vadd.f32 %v395_v32, %v106_v35 }
  0xfb   :  { %1849 = vmatpush1.bf16.msra.mxu1 %v1848_v4  ;;  %v2265_v54 = vsel %vm436_vm11, %v265_v43, %v476_v33  ;;  %v477_v55 = vmul.f32 0.01, %v2256_v48  ;;  %vm440_vm15 = vcmp.gt.f32.partialorder %v271_v51, 0.0  ;;  %v2270_v59 = vmul.f32 0.01, %v2258_v47 }
  0xfc   :  { %v276_v56 = vpop.f32.mrb[16].mxu0  ;;  %v480_v60 = vmul.f32 0.01, %v271_v51  ;;  %v273_v63 = vadd.f32 %v272_v49, %v106_v35  ;;  %v2272_v2 = vsel %vm438_vm13, %v390_v46, %v478_v53  ;;  %v398_v58 = vadd.f32 %v397_v50, %v106_v35 }
  0xfd   :  { %v401_v57 = vpop.f32.mrb[16].mxu1  ;;  %v278_v0 = vpop.f32.mrb[17].mxu0  ;;  %v509_v61 = vsel %vm429_vm6, %v2222_v6, %v2230_v17  ;;  %v513_v4 = vsel %vm433_vm10, %v261_v20, %v473_v37  ;;  %vm439_vm0 = vcmp.gt.f32.partialorder %v2258_v47, 0.0  ;;  %vm442_vm1 = vcmp.gt.f32.partialorder %v396_v62, 0.0 }
  0xfe   :  { %v403_v1 = vpop.f32.mrb[17].mxu1  ;;  %v2280_v5 = vsel %vm440_vm15, %v271_v51, %v480_v60  ;;  %v482_v7 = vmul.f32 0.01, %v396_v62  ;;  %v511_v8 = vsel %vm431_vm8, %v2224_v10, %v471_v24  ;;  %vm441_vm2 = vcmp.gt.f32.partialorder %v273_v63, 0.0  ;;  %v116_v20 = vpop.permute.xlu1 %115  ;;  %v535_v60 = vld [vmem:[%s2578_s3 + $0x18] sm:$0xff] }
  0xff   :  { %v1836_v11 = vpack.c.bf16 %v2280_v5, %v2265_v54  ;;  %v481_v12 = vmul.f32 0.01, %v273_v63  ;;  %vm443_vm3 = vcmp.gt.f32.partialorder %v398_v58, 0.0  ;;  %v1830_v14 = vpack.c.bf16 %v513_v4, %v509_v61  ;;  %v555_v61 = vpop.permute.xlu0 %554 }
 0x100   :  { %v282_v6 = vpop.f32.mrb[18].mxu0  ;;  %v522_v13 = vsel %vm442_vm1, %v396_v62, %v482_v7  ;;  %v515_v15 = vsel %vm435_vm12, %v2236_v25, %v475_v52  ;;  %v277_v17 = vadd.f32 %v276_v56, %v111_v9  ;;  %v402_v22 = vadd.f32 %v401_v57, %v111_v9  ;;  %v533_v57 = vld [vmem:[%s2578_s3 + $0x8] sm:$0xff]  ;;  %v536_v62 = vld [vmem:[%s2578_s3 + $0x20] sm:$0xff] }
 0x101   :  { %v407_v18 = vpop.f32.mrb[18].mxu1  ;;  %v284_v19 = vpop.f32.mrb[19].mxu0  ;;  %v1856_v10 = vpack.c.bf16 %v522_v13, %v2272_v2  ;;  %v1850_v21 = vpack.c.bf16 %v515_v15, %v511_v8  ;;  %v279_v24 = vadd.f32 %v278_v0, %v111_v9  ;;  %1831 = vmatprep.subr.bf16.mxu0 %v1830_v14  ;;  %v404_v28 = vadd.f32 %v403_v1, %v111_v9  ;;  %v538_v0 = vld [vmem:[%s2578_s3 + $0x30] sm:$0xff]  ;;  %v539_v1 = vld [vmem:[%s2578_s3 + $0x38] sm:$0xff]  ;;  %v540_v2 = vld [vmem:[%s2578_s3 + $0x40] sm:$0xff] }
 0x102   :  { %v409_v26 = vpop.f32.mrb[19].mxu1  ;;  %vm444_vm4 = vcmp.gt.f32.partialorder %v277_v17, 0.0  ;;  %v484_v27 = vmul.f32 0.01, %v277_v17  ;;  %v283_v30 = vadd.f32 %v282_v6, %v116_v20  ;;  %v483_v31 = vmul.f32 0.01, %v398_v58  ;;  %1833 = vmatpush1.bf16.msra.mxu0 %v1832_v36  ;;  %v560_v14 = vpop.permute.xlu1 %559 }
 0x103   :  { %1851 = vmatprep.subr.bf16.mxu1 %v1850_v21  ;;  %vm446_vm5 = vcmp.gt.f32.partialorder %v402_v22, 0.0  ;;  %v486_v25 = vmul.f32 0.01, %v402_v22  ;;  %vm445_vm6 = vcmp.gt.f32.partialorder %v279_v24, 0.0  ;;  %v485_v35 = vmul.f32 0.01, %v279_v24 }
 0x104   :  { %1853 = vmatpush1.bf16.msra.mxu1 %v1852_v42  ;;  %v524_v34 = vsel %vm444_vm4, %v277_v17, %v484_v27  ;;  %vm447_vm7 = vcmp.gt.f32.partialorder %v404_v28, 0.0  ;;  %vm448_vm8 = vcmp.gt.f32.partialorder %v283_v30, 0.0  ;;  %v487_v37 = vmul.f32 0.01, %v404_v28 }
 0x105   :  { %v488_v38 = vmul.f32 0.01, %v283_v30  ;;  %v408_v40 = vadd.f32 %v407_v18, %v116_v20  ;;  %v285_v41 = vadd.f32 %v284_v19, %v116_v20  ;;  %v526_v43 = vsel %vm446_vm5, %v402_v22, %v486_v25 }
 0x106   :  { %v410_v44 = vadd.f32 %v409_v26, %v116_v20  ;;  %v517_v16 = vsel %vm437_vm14, %v2256_v48, %v477_v55  ;;  %v521_v29 = vsel %vm441_vm2, %v273_v63, %v481_v12  ;;  %v519_v49 = vsel %vm439_vm0, %v2258_v47, %v2270_v59  ;;  %v532_v47 = vld [vmem:[%s2578_s3] sm:$0xff]  ;;  %v534_v59 = vld [vmem:[%s2578_s3 + $0x10] sm:$0xff]  ;;  %v537_v63 = vld [vmem:[%s2578_s3 + $0x28] sm:$0xff] }
 0x107   :  { %v528_v36 = vsel %vm448_vm8, %v283_v30, %v488_v38  ;;  %vm450_vm9 = vcmp.gt.f32.partialorder %v408_v40, 0.0  ;;  %v490_v23 = vmul.f32 0.01, %v408_v40  ;;  %vm449_vm10 = vcmp.gt.f32.partialorder %v285_v41, 0.0  ;;  %v565_v30 = vpop.permute.xlu0 %564 }
 0x108   :  { %v1840_v39 = vpack.c.bf16 %v528_v36, %v524_v34  ;;  %v489_v32 = vmul.f32 0.01, %v285_v41  ;;  %vm451_vm11 = vcmp.gt.f32.partialorder %v410_v44, 0.0  ;;  %v491_v42 = vmul.f32 0.01, %v410_v44 }
 0x109   :  { %v530_v45 = vsel %vm450_vm9, %v408_v40, %v490_v23  ;;  %v1834_v46 = vpack.c.bf16 %v521_v29, %v517_v16  ;;  %v523_v50 = vsel %vm443_vm3, %v398_v58, %v483_v31  ;;  %v525_v51 = vsel %vm445_vm6, %v279_v24, %v485_v35  ;;  %v541_v58 = vld [vmem:[%s2578_s3 + $0x48] sm:$0xff] }
 0x10a   :  { %v1860_v48 = vpack.c.bf16 %v530_v45, %v526_v43  ;;  %v1854_v33 = vpack.c.bf16 %v523_v50, %v519_v49  ;;  %v529_v52 = vsel %vm449_vm10, %v285_v41, %v489_v32  ;;  %v527_v54 = vsel %vm447_vm7, %v404_v28, %v487_v37 }
 0x10b   :  { %1835 = vmatprep.subr.bf16.mxu0 %v1834_v46  ;;  %v1838_v53 = vpack.c.bf16 %v529_v52, %v525_v51  ;;  %v531_v55 = vsel %vm451_vm11, %v410_v44, %v491_v42  ;;  %vm602_vm12 = vcmask 654336   ;;  %v570_v51 = vpop.permute.xlu1 %569 }
 0x10c   :  { %1855 = vmatprep.subr.bf16.mxu1 %v1854_v33  ;;  %1837 = vmatpush1.bf16.msra.mxu0 %v1836_v11  ;;  %v1858_v56 = vpack.c.bf16 %v531_v55, %v527_v54  ;;  %v575_v33 = vpop.permute.xlu0 %574 }
 0x10d   :  { %1857 = vmatpush1.bf16.msra.mxu1 %v1856_v10  ;;  %1839 = vmatprep.subr.bf16.mxu0 %v1838_v53 }
 0x10e   :  { %1859 = vmatprep.subr.bf16.mxu1 %v1858_v56 }
 0x110   :  { %1841 = vmatpush1.bf16.msra.mxu0 %v1840_v39 }
 0x111   :  { %1861 = vmatpush1.bf16.msra.mxu1 %v1860_v48 }
 0x113   :  { %1768 = vmatmul.mubr.msk.f32.vlgmr.msra.gmra.mrb[20].mxu0 %vm602_vm12, %v532_v47 }
 0x114   :  { %1778 = vmatmul.mubr.msk.f32.vlgmr.msra.gmra.mrb[20].mxu1 %vm602_vm12, %v532_v47  ;;  %703 = vmatprep.mubr.f32.mxu0 %v1933_v3 }
 0x115   :  { %828 = vmatprep.mubr.f32.mxu1 %v1933_v3 }
 0x117   :  { %1769 = vmatmul.mubr.msk.f32.gmra.mrb[22].mxu0 %vm602_vm12, %v533_v57 }
 0x118   :  { %1779 = vmatmul.mubr.msk.f32.gmra.mrb[22].mxu1 %vm602_vm12, %v533_v57  ;;  %709 = vmatprep.mubr.f32.mxu0 %v1933_v3 }
 0x119   :  { %834 = vmatprep.mubr.f32.mxu1 %v1933_v3 }
 0x11b   :  { %1770 = vmatmul.mubr.msk.f32.gmra.mrb[24].mxu0 %vm602_vm12, %v534_v59 }
 0x11c   :  { %1780 = vmatmul.mubr.msk.f32.gmra.mrb[24].mxu1 %vm602_vm12, %v534_v59  ;;  %715 = vmatprep.mubr.f32.mxu0 %v1933_v3 }
 0x11d   :  { %840 = vmatprep.mubr.f32.mxu1 %v1933_v3 }
 0x11f   :  { %1771 = vmatmul.mubr.msk.f32.gmra.mrb[26].mxu0 %vm602_vm12, %v535_v60 }
 0x120   :  { %1781 = vmatmul.mubr.msk.f32.gmra.mrb[26].mxu1 %vm602_vm12, %v535_v60  ;;  %721 = vmatprep.mubr.f32.mxu0 %v1933_v3 }
 0x121   :  { %846 = vmatprep.mubr.f32.mxu1 %v1933_v3 }
 0x123   :  { %1772 = vmatmul.mubr.msk.f32.gmra.mrb[28].mxu0 %vm602_vm12, %v536_v62 }
 0x124   :  { %1782 = vmatmul.mubr.msk.f32.gmra.mrb[28].mxu1 %vm602_vm12, %v536_v62  ;;  %727 = vmatprep.mubr.f32.mxu0 %v1933_v3 }
 0x125   :  { %852 = vmatprep.mubr.f32.mxu1 %v1933_v3 }
 0x127   :  { %1773 = vmatmul.mubr.msk.f32.gmra.mrb[30].mxu0 %vm602_vm12, %v537_v63 }
 0x128   :  { %1783 = vmatmul.mubr.msk.f32.gmra.mrb[30].mxu1 %vm602_vm12, %v537_v63  ;;  %733 = vmatprep.mubr.f32.mxu0 %v1933_v3 }
 0x129   :  { %858 = vmatprep.mubr.f32.mxu1 %v1933_v3 }
 0x12b   :  { %1774 = vmatmul.mubr.msk.f32.gmra.mrb[32].mxu0 %vm602_vm12, %v538_v0 }
 0x12c   :  { %1784 = vmatmul.mubr.msk.f32.gmra.mrb[32].mxu1 %vm602_vm12, %v538_v0  ;;  %739 = vmatprep.mubr.f32.mxu0 %v1933_v3 }
 0x12d   :  { %864 = vmatprep.mubr.f32.mxu1 %v1933_v3 }
 0x12f   :  { %1775 = vmatmul.mubr.msk.f32.gmra.mrb[34].mxu0 %vm602_vm12, %v539_v1 }
 0x130   :  { %1785 = vmatmul.mubr.msk.f32.gmra.mrb[34].mxu1 %vm602_vm12, %v539_v1  ;;  %745 = vmatprep.mubr.f32.mxu0 %v1933_v3 }
 0x131   :  { %870 = vmatprep.mubr.f32.mxu1 %v1933_v3 }
 0x133   :  { %1776 = vmatmul.mubr.msk.f32.gmra.mrb[36].mxu0 %vm602_vm12, %v540_v2 }
 0x134   :  { %1786 = vmatmul.mubr.msk.f32.gmra.mrb[36].mxu1 %vm602_vm12, %v540_v2  ;;  %751 = vmatprep.mubr.f32.mxu0 %v1933_v3 }
 0x135   :  { %876 = vmatprep.mubr.f32.mxu1 %v1933_v3 }
 0x137   :  { %1777 = vmatmul.mubr.msk.f32.gmra.mrb[38].mxu0 %vm602_vm12, %v541_v58 }
 0x138   :  { %1787 = vmatmul.mubr.msk.f32.gmra.mrb[38].mxu1 %vm602_vm12, %v541_v58  ;;  %1117 = vmatprep.mubr.f32.mxu0 %v1933_v3 }
 0x139   :  { %1212 = vmatprep.mubr.f32.mxu1 %v1933_v3 }
 0x1e6   :  { %v699_v4 = vpop.f32.mrb[20].mxu0 }
 0x1e7   :  { %v700_v5 = vadd.f32 %v699_v4, %v555_v61  ;;  %v824_v7 = vpop.f32.mrb[20].mxu1  ;;  %v701_v8 = vpop.f32.mrb[21].mxu0 }
 0x1e8   :  { %v825_v9 = vadd.f32 %v824_v7, %v555_v61  ;;  %v702_v11 = vadd.f32 %v701_v8, %v555_v61  ;;  %v826_v12 = vpop.f32.mrb[21].mxu1 }
 0x1e9   :  { %v923_v6 = vmul.f32 0.01, %v700_v5  ;;  %v827_v13 = vadd.f32 %v826_v12, %v555_v61  ;;  %vm883_vm13 = vcmp.gt.f32.partialorder %v700_v5, 0.0 }
 0x1ea   :  { %vm885_vm14 = vcmp.gt.f32.partialorder %v825_v9, 0.0  ;;  %v925_v15 = vmul.f32 0.01, %v825_v9  ;;  %v705_v17 = vpop.f32.mrb[22].mxu0  ;;  %vm884_vm15 = vcmp.gt.f32.partialorder %v702_v11, 0.0 }
 0x1eb   :  { %v830_v18 = vpop.f32.mrb[22].mxu1  ;;  %v924_v19 = vmul.f32 0.01, %v702_v11  ;;  %v706_v20 = vadd.f32 %v705_v17, %v560_v14  ;;  %v707_v21 = vpop.f32.mrb[23].mxu0  ;;  %v2378_v24 = vsel %vm883_vm13, %v700_v5, %v923_v6  ;;  %v926_v26 = vmul.f32 0.01, %v827_v13 }
 0x1ec   :  { %v831_v10 = vadd.f32 %v830_v18, %v560_v14  ;;  %v832_v22 = vpop.f32.mrb[23].mxu1  ;;  %v708_v27 = vadd.f32 %v707_v21, %v560_v14  ;;  %vm886_vm2 = vcmp.gt.f32.partialorder %v827_v13, 0.0  ;;  %v965_v37 = vsel %vm885_vm14, %v825_v9, %v925_v15 }
 0x1ed   :  { %v833_v28 = vadd.f32 %v832_v22, %v560_v14  ;;  %vm887_vm0 = vcmp.gt.f32.partialorder %v706_v20, 0.0  ;;  %v927_v31 = vmul.f32 0.01, %v706_v20  ;;  %v964_v53 = vsel %vm884_vm15, %v702_v11, %v924_v19  ;;  %v580_v14 = vpop.permute.xlu1 %579 }
 0x1ee   :  { %vm889_vm1 = vcmp.gt.f32.partialorder %v831_v10, 0.0  ;;  %v929_v25 = vmul.f32 0.01, %v831_v10  ;;  %vm888_vm3 = vcmp.gt.f32.partialorder %v708_v27, 0.0  ;;  %v928_v34 = vmul.f32 0.01, %v708_v27 }
 0x1ef   :  { %v930_v35 = vmul.f32 0.01, %v833_v28  ;;  %v967_v38 = vsel %vm887_vm0, %v706_v20, %v927_v31  ;;  %vm890_vm4 = vcmp.gt.f32.partialorder %v833_v28, 0.0  ;;  %v711_v41 = vpop.f32.mrb[24].mxu0  ;;  %v836_v43 = vpop.f32.mrb[24].mxu1  ;;  %v966_v54 = vsel %vm886_vm2, %v827_v13, %v926_v26 }
 0x1f0   :  { %v969_v40 = vsel %vm889_vm1, %v831_v10, %v929_v25  ;;  %v1864_v44 = vpack.c.bf16 %v967_v38, %v2378_v24  ;;  %v712_v29 = vadd.f32 %v711_v41, %v565_v30  ;;  %v837_v36 = vadd.f32 %v836_v43, %v565_v30  ;;  %v713_v23 = vpop.f32.mrb[25].mxu0  ;;  %v838_v39 = vpop.f32.mrb[25].mxu1 }
 0x1f1   :  { %v1884_v16 = vpack.c.bf16 %v969_v40, %v965_v37  ;;  %v714_v32 = vadd.f32 %v713_v23, %v565_v30  ;;  %v2382_v42 = vadd.f32 %v838_v39, %v565_v30  ;;  %v968_v46 = vsel %vm888_vm3, %v708_v27, %v928_v34 }
 0x1f2   :  { %v717_v45 = vpop.f32.mrb[26].mxu0  ;;  %vm891_vm5 = vcmp.gt.f32.partialorder %v712_v29, 0.0  ;;  %v931_v49 = vmul.f32 0.01, %v712_v29  ;;  %v933_v50 = vmul.f32 0.01, %v837_v36  ;;  %v970_v48 = vsel %vm890_vm4, %v833_v28, %v930_v35 }
 0x1f3   :  { %vm893_vm6 = vcmp.gt.f32.partialorder %v837_v36, 0.0  ;;  %v932_v52 = vmul.f32 0.01, %v714_v32  ;;  %vm892_vm7 = vcmp.gt.f32.partialorder %v714_v32, 0.0  ;;  %v2389_v55 = vmul.f32 0.01, %v2382_v42 }
 0x1f4   :  { %v718_v56 = vadd.f32 %v717_v45, %v570_v51  ;;  %v842_v47 = vpop.f32.mrb[26].mxu1  ;;  %v719_v57 = vpop.f32.mrb[27].mxu0  ;;  %v1862_v59 = vpack.c.bf16 %v968_v46, %v964_v53  ;;  %v2392_v60 = vsel %vm891_vm5, %v712_v29, %v931_v49  ;;  %vm894_vm8 = vcmp.gt.f32.partialorder %v2382_v42, 0.0 }
 0x1f5   :  { %v843_v62 = vadd.f32 %v842_v47, %v570_v51  ;;  %v720_v63 = vadd.f32 %v719_v57, %v570_v51  ;;  %v844_v0 = vpop.f32.mrb[27].mxu1  ;;  %v1882_v1 = vpack.c.bf16 %v970_v48, %v966_v54  ;;  %v2396_v58 = vsel %vm893_vm6, %v837_v36, %v933_v50  ;;  %v585_v46 = vpop.permute.xlu0 %584 }
 0x1f6   :  { %v723_v2 = vpop.f32.mrb[28].mxu0  ;;  %vm895_vm9 = vcmp.gt.f32.partialorder %v718_v56, 0.0  ;;  %v935_v61 = vmul.f32 0.01, %v718_v56  ;;  %1863 = vmatprep.subr.bf16.mxu0 %v1862_v59  ;;  %v845_v9 = vadd.f32 %v844_v0, %v570_v51  ;;  %v972_v11 = vsel %vm892_vm7, %v714_v32, %v932_v52  ;;  %v590_v51 = vpop.permute.xlu1 %589 }
 0x1f7   :  { %v724_v4 = vadd.f32 %v723_v2, %v575_v33  ;;  %v848_v5 = vpop.f32.mrb[28].mxu1  ;;  %v725_v7 = vpop.f32.mrb[29].mxu0  ;;  %vm897_vm10 = vcmp.gt.f32.partialorder %v843_v62, 0.0  ;;  %v937_v8 = vmul.f32 0.01, %v843_v62  ;;  %1883 = vmatprep.subr.bf16.mxu1 %v1882_v1  ;;  %1865 = vmatpush1.bf16.msra.mxu0 %v1864_v44  ;;  %vm896_vm11 = vcmp.gt.f32.partialorder %v720_v63, 0.0 }
 0x1f8   :  { %v975_v12 = vsel %vm895_vm9, %v718_v56, %v935_v61  ;;  %v936_v6 = vmul.f32 0.01, %v720_v63  ;;  %1885 = vmatpush1.bf16.msra.mxu1 %v1884_v16  ;;  %v850_v13 = vpop.f32.mrb[29].mxu1  ;;  %v849_v19 = vadd.f32 %v848_v5, %v575_v33  ;;  %v2401_v21 = vadd.f32 %v725_v7, %v575_v33 }
 0x1f9   :  { %vm899_vm13 = vcmp.gt.f32.partialorder %v724_v4, 0.0  ;;  %v1868_v15 = vpack.c.bf16 %v975_v12, %v2392_v60  ;;  %v977_v17 = vsel %vm897_vm10, %v843_v62, %v937_v8  ;;  %v939_v18 = vmul.f32 0.01, %v724_v4 }
 0x1fa   :  { %v729_v20 = vpop.f32.mrb[30].mxu0  ;;  %v1888_v10 = vpack.c.bf16 %v977_v17, %v2396_v58  ;;  %v2403_v22 = vadd.f32 %v850_v13, %v575_v33  ;;  %vm898_vm14 = vcmp.gt.f32.partialorder %v845_v9, 0.0  ;;  %v938_v28 = vmul.f32 0.01, %v845_v9 }
 0x1fb   :  { %v730_v24 = vadd.f32 %v729_v20, %v580_v14  ;;  %v854_v26 = vpop.f32.mrb[30].mxu1  ;;  %v731_v27 = vpop.f32.mrb[31].mxu0  ;;  %v2406_v30 = vsel %vm899_vm13, %v724_v4, %v939_v18  ;;  %vm901_vm15 = vcmp.gt.f32.partialorder %v849_v19, 0.0  ;;  %v941_v34 = vmul.f32 0.01, %v849_v19 }
 0x1fc   :  { %v855_v31 = vadd.f32 %v854_v26, %v580_v14  ;;  %v856_v25 = vpop.f32.mrb[31].mxu1  ;;  %vm900_vm0 = vcmp.gt.f32.partialorder %v2401_v21, 0.0  ;;  %v940_v35 = vmul.f32 0.01, %v2401_v21  ;;  %vm902_vm1 = vcmp.gt.f32.partialorder %v2403_v22, 0.0 }
 0x1fd   :  { %vm903_vm2 = vcmp.gt.f32.partialorder %v730_v24, 0.0  ;;  %v943_v37 = vmul.f32 0.01, %v730_v24  ;;  %v942_v40 = vmul.f32 0.01, %v2403_v22  ;;  %v732_v43 = vadd.f32 %v731_v27, %v580_v14 }
 0x1fe   :  { %vm905_vm3 = vcmp.gt.f32.partialorder %v855_v31, 0.0  ;;  %v735_v38 = vpop.f32.mrb[32].mxu0  ;;  %v945_v41 = vmul.f32 0.01, %v855_v31  ;;  %v976_v44 = vsel %vm896_vm11, %v720_v63, %v936_v6  ;;  %v857_v23 = vadd.f32 %v856_v25, %v580_v14 }
 0x1ff   :  { %v860_v16 = vpop.f32.mrb[32].mxu1  ;;  %v737_v29 = vpop.f32.mrb[33].mxu0  ;;  %v2413_v36 = vsel %vm903_vm2, %v730_v24, %v943_v37  ;;  %v1866_v39 = vpack.c.bf16 %v976_v44, %v972_v11  ;;  %v978_v32 = vsel %vm898_vm14, %v845_v9, %v938_v28  ;;  %v2417_v49 = vsel %vm901_vm15, %v849_v19, %v941_v34 }
 0x200   :  { %v862_v45 = vpop.f32.mrb[33].mxu1  ;;  %v1872_v50 = vpack.c.bf16 %v2413_v36, %v2406_v30  ;;  %v2422_v48 = vsel %vm905_vm3, %v855_v31, %v945_v41  ;;  %v974_v33 = vsel %vm894_vm8, %v2382_v42, %v2389_v55  ;;  %vm904_vm4 = vcmp.gt.f32.partialorder %v732_v43, 0.0  ;;  %v600_v37 = vpop.permute.xlu1 %599 }
 0x201   :  { %v1892_v52 = vpack.c.bf16 %v2422_v48, %v2417_v49  ;;  %v944_v53 = vmul.f32 0.01, %v732_v43  ;;  %1867 = vmatprep.subr.bf16.mxu0 %v1866_v39  ;;  %v1886_v54 = vpack.c.bf16 %v978_v32, %v974_v33  ;;  %v736_v47 = vadd.f32 %v735_v38, %v585_v46 }
 0x202   :  { %v741_v56 = vpop.f32.mrb[34].mxu0  ;;  %1869 = vmatpush1.bf16.msra.mxu0 %v1868_v15  ;;  %v861_v57 = vadd.f32 %v860_v16, %v585_v46  ;;  %v2430_v59 = vadd.f32 %v737_v29, %v585_v46  ;;  %v2432_v60 = vadd.f32 %v862_v45, %v585_v46  ;;  %vm906_vm5 = vcmp.gt.f32.partialorder %v857_v23, 0.0 }
 0x203   :  { %v866_v62 = vpop.f32.mrb[34].mxu1  ;;  %v743_v63 = vpop.f32.mrb[35].mxu0  ;;  %1887 = vmatprep.subr.bf16.mxu1 %v1886_v54  ;;  %v742_v42 = vadd.f32 %v741_v56, %v590_v51  ;;  %vm907_vm6 = vcmp.gt.f32.partialorder %v736_v47, 0.0  ;;  %v947_v2 = vmul.f32 0.01, %v736_v47  ;;  %v980_v7 = vsel %vm900_vm0, %v2401_v21, %v940_v35 }
 0x204   :  { %v867_v55 = vadd.f32 %v866_v62, %v590_v51  ;;  %v2434_v0 = vadd.f32 %v743_v63, %v590_v51  ;;  %v868_v1 = vpop.f32.mrb[35].mxu1  ;;  %1889 = vmatpush1.bf16.msra.mxu1 %v1888_v10  ;;  %vm909_vm7 = vcmp.gt.f32.partialorder %v861_v57, 0.0  ;;  %v949_v58 = vmul.f32 0.01, %v861_v57  ;;  %v595_v10 = vpop.permute.xlu0 %594 }
 0x205   :  { %v946_v61 = vmul.f32 0.01, %v857_v23  ;;  %v2437_v4 = vmul.f32 0.01, %v2430_v59  ;;  %v2440_v5 = vmul.f32 0.01, %v2432_v60  ;;  %v2445_v8 = vsel %vm907_vm6, %v736_v47, %v947_v2 }
 0x206   :  { %vm908_vm8 = vcmp.gt.f32.partialorder %v2430_v59, 0.0  ;;  %vm911_vm9 = vcmp.gt.f32.partialorder %v742_v42, 0.0  ;;  %v951_v9 = vmul.f32 0.01, %v742_v42  ;;  %v747_v11 = vpop.f32.mrb[36].mxu0  ;;  %v2448_v6 = vsel %vm909_vm7, %v861_v57, %v949_v58 }
 0x207   :  { %v872_v12 = vpop.f32.mrb[36].mxu1  ;;  %vm910_vm10 = vcmp.gt.f32.partialorder %v2432_v60, 0.0  ;;  %vm913_vm11 = vcmp.gt.f32.partialorder %v867_v55, 0.0  ;;  %v953_v13 = vmul.f32 0.01, %v867_v55  ;;  %vm912_vm13 = vcmp.gt.f32.partialorder %v2434_v0, 0.0 }
 0x208   :  { %v2452_v14 = vsel %vm911_vm9, %v742_v42, %v951_v9  ;;  %v869_v15 = vadd.f32 %v868_v1, %v590_v51  ;;  %v984_v17 = vsel %vm904_vm4, %v732_v43, %v944_v53  ;;  %v982_v18 = vsel %vm902_vm1, %v2403_v22, %v942_v40  ;;  %v749_v19 = vpop.f32.mrb[37].mxu0  ;;  %v874_v20 = vpop.f32.mrb[37].mxu1  ;;  %v1007_v9 = vld [vmem:[%s2579_s5 + $0x20] sm:$0xff] }
 0x209   :  { %v1876_v21 = vpack.c.bf16 %v2452_v14, %v2445_v8  ;;  %v2460_v24 = vsel %vm913_vm11, %v867_v55, %v953_v13  ;;  %v1870_v26 = vpack.c.bf16 %v984_v17, %v980_v7  ;;  %v986_v27 = vsel %vm906_vm5, %v857_v23, %v946_v61  ;;  %v1005_v7 = vld [vmem:[%s2579_s5 + $0x10] sm:$0xff]  ;;  %v1006_v8 = vld [vmem:[%s2579_s5 + $0x18] sm:$0xff] }
 0x20a   :  { %v753_v28 = vpop.f32.mrb[38].mxu0  ;;  %v1896_v31 = vpack.c.bf16 %v2460_v24, %v2448_v6  ;;  %v952_v25 = vmul.f32 0.01, %v2434_v0  ;;  %vm914_vm14 = vcmp.gt.f32.partialorder %v869_v15, 0.0  ;;  %v1890_v34 = vpack.c.bf16 %v986_v27, %v982_v18 }
 0x20b   :  { %v878_v22 = vpop.f32.mrb[38].mxu1  ;;  %v755_v35 = vpop.f32.mrb[39].mxu0  ;;  %1871 = vmatprep.subr.bf16.mxu0 %v1870_v26  ;;  %v748_v38 = vadd.f32 %v747_v11, %v595_v10  ;;  %v873_v40 = vadd.f32 %v872_v12, %v595_v10  ;;  %v750_v41 = vadd.f32 %v749_v19, %v595_v10  ;;  %v875_v43 = vadd.f32 %v874_v20, %v595_v10 }
 0x20c   :  { %v880_v44 = vpop.f32.mrb[39].mxu1  ;;  %v954_v16 = vmul.f32 0.01, %v869_v15  ;;  %1891 = vmatprep.subr.bf16.mxu1 %v1890_v34  ;;  %1873 = vmatpush1.bf16.msra.mxu0 %v1872_v50  ;;  %v754_v29 = vadd.f32 %v753_v28, %v600_v37  ;;  %v879_v23 = vadd.f32 %v878_v22, %v600_v37  ;;  %v756_v39 = vadd.f32 %v755_v35, %v600_v37  ;;  %v1016_v11 = vpop.permute.xlu0 %1015 }
 0x20d   :  { %1893 = vmatpush1.bf16.msra.mxu1 %v1892_v52  ;;  %vm915_vm15 = vcmp.gt.f32.partialorder %v748_v38, 0.0  ;;  %v955_v32 = vmul.f32 0.01, %v748_v38  ;;  %vm917_vm0 = vcmp.gt.f32.partialorder %v873_v40, 0.0  ;;  %v957_v45 = vmul.f32 0.01, %v873_v40  ;;  %v1021_v20 = vpop.permute.xlu1 %1020 }
 0x20e   :  { %vm916_vm1 = vcmp.gt.f32.partialorder %v750_v41, 0.0  ;;  %v956_v46 = vmul.f32 0.01, %v750_v41  ;;  %vm918_vm2 = vcmp.gt.f32.partialorder %v875_v43, 0.0  ;;  %v958_v33 = vmul.f32 0.01, %v875_v43 }
 0x20f   :  { %v995_v51 = vsel %vm915_vm15, %v748_v38, %v955_v32  ;;  %v997_v53 = vsel %vm917_vm0, %v873_v40, %v957_v45  ;;  %vm919_vm3 = vcmp.gt.f32.partialorder %v754_v29, 0.0  ;;  %v959_v30 = vmul.f32 0.01, %v754_v29 }
 0x210   :  { %vm921_vm4 = vcmp.gt.f32.partialorder %v879_v23, 0.0  ;;  %v961_v36 = vmul.f32 0.01, %v879_v23  ;;  %vm920_vm5 = vcmp.gt.f32.partialorder %v756_v39, 0.0  ;;  %v960_v50 = vmul.f32 0.01, %v756_v39  ;;  %v1026_v40 = vpop.permute.xlu0 %1025 }
 0x211   :  { %v999_v54 = vsel %vm919_vm3, %v754_v29, %v959_v30  ;;  %v881_v56 = vadd.f32 %v880_v44, %v600_v37  ;;  %v988_v49 = vsel %vm908_vm8, %v2430_v59, %v2437_v4  ;;  %v992_v48 = vsel %vm912_vm13, %v2434_v0, %v952_v25 }
 0x212   :  { %v1880_v52 = vpack.c.bf16 %v999_v54, %v995_v51  ;;  %v1001_v47 = vsel %vm921_vm4, %v879_v23, %v961_v36  ;;  %v1874_v57 = vpack.c.bf16 %v992_v48, %v988_v49  ;;  %v990_v62 = vsel %vm910_vm10, %v2432_v60, %v2440_v5  ;;  %v1003_v60 = vld [vmem:[%s2579_s5] sm:$0xff]  ;;  %v1004_v5 = vld [vmem:[%s2579_s5 + $0x8] sm:$0xff] }
 0x213   :  { %v1900_v63 = vpack.c.bf16 %v1001_v47, %v997_v53  ;;  %vm922_vm6 = vcmp.gt.f32.partialorder %v881_v56, 0.0  ;;  %v962_v42 = vmul.f32 0.01, %v881_v56  ;;  %v994_v55 = vsel %vm914_vm14, %v869_v15, %v954_v16 }
 0x214   :  { %1875 = vmatprep.subr.bf16.mxu0 %v1874_v57  ;;  %v1894_v1 = vpack.c.bf16 %v994_v55, %v990_v62  ;;  %v996_v59 = vsel %vm916_vm1, %v750_v41, %v956_v46  ;;  %v1000_v2 = vsel %vm920_vm5, %v756_v39, %v960_v50  ;;  %v998_v58 = vsel %vm918_vm2, %v875_v43, %v958_v33 }
 0x215   :  { %1877 = vmatpush1.bf16.msra.mxu0 %v1876_v21  ;;  %v1878_v0 = vpack.c.bf16 %v1000_v2, %v996_v59  ;;  %v1002_v61 = vsel %vm922_vm6, %v881_v56, %v962_v42  ;;  %v1031_v56 = vpop.permute.xlu1 %1030 }
 0x216   :  { %1895 = vmatprep.subr.bf16.mxu1 %v1894_v1  ;;  %v1898_v4 = vpack.c.bf16 %v1002_v61, %v998_v58 }
 0x217   :  { %1897 = vmatpush1.bf16.msra.mxu1 %v1896_v31  ;;  %1879 = vmatprep.subr.bf16.mxu0 %v1878_v0 }
 0x218   :  { %1899 = vmatprep.subr.bf16.mxu1 %v1898_v4 }
 0x219   :  { %1881 = vmatpush1.bf16.msra.mxu0 %v1880_v52 }
 0x21b   :  { %1901 = vmatpush1.bf16.msra.mxu1 %v1900_v63 }
 0x21c   :  { %1788 = vmatmul.mubr.msk.f32.vlgmr.msra.gmra.mrb[40].mxu0 %vm602_vm12, %v1003_v60 }
 0x21d   :  { %1123 = vmatprep.mubr.f32.mxu0 %v1933_v3 }
 0x21e   :  { %1793 = vmatmul.mubr.msk.f32.vlgmr.msra.gmra.mrb[40].mxu1 %vm602_vm12, %v1003_v60 }
 0x21f   :  { %1218 = vmatprep.mubr.f32.mxu1 %v1933_v3 }
 0x220   :  { %1789 = vmatmul.mubr.msk.f32.gmra.mrb[42].mxu0 %vm602_vm12, %v1004_v5 }
 0x221   :  { %1129 = vmatprep.mubr.f32.mxu0 %v1933_v3 }
 0x222   :  { %1794 = vmatmul.mubr.msk.f32.gmra.mrb[42].mxu1 %vm602_vm12, %v1004_v5 }
 0x223   :  { %1224 = vmatprep.mubr.f32.mxu1 %v1933_v3 }
 0x224   :  { %1790 = vmatmul.mubr.msk.f32.gmra.mrb[44].mxu0 %vm602_vm12, %v1005_v7 }
 0x225   :  { %1135 = vmatprep.mubr.f32.mxu0 %v1933_v3 }
 0x226   :  { %1795 = vmatmul.mubr.msk.f32.gmra.mrb[44].mxu1 %vm602_vm12, %v1005_v7 }
 0x227   :  { %1230 = vmatprep.mubr.f32.mxu1 %v1933_v3 }
 0x228   :  { %1791 = vmatmul.mubr.msk.f32.gmra.mrb[46].mxu0 %vm602_vm12, %v1006_v8 }
 0x229   :  { %1141 = vmatprep.mubr.f32.mxu0 %v1933_v3 }
 0x22a   :  { %1796 = vmatmul.mubr.msk.f32.gmra.mrb[46].mxu1 %vm602_vm12, %v1006_v8 }
 0x22b   :  { %1236 = vmatprep.mubr.f32.mxu1 %v1933_v3 }
 0x22c   :  { %1792 = vmatmul.mubr.msk.f32.gmra.mrb[48].mxu0 %vm602_vm12, %v1007_v9 }
 0x22d   :  { %1398 = vmatprep.mubr.f32.mxu0 %v1933_v3 }
 0x22e   :  { %1797 = vmatmul.mubr.msk.f32.gmra.mrb[48].mxu1 %vm602_vm12, %v1007_v9 }
 0x22f   :  { %1481 = vmatprep.mubr.f32.mxu1 %v1933_v3 }
 0x2ef   :  { %v1119_v12 = vpop.f32.mrb[40].mxu0 }
 0x2f0   :  { %v1120_v6 = vadd.f32 %v1119_v12, %v1016_v11  ;;  %v1121_v13 = vpop.f32.mrb[41].mxu0 }
 0x2f1   :  { %v1214_v14 = vpop.f32.mrb[40].mxu1  ;;  %v1122_v15 = vadd.f32 %v1121_v13, %v1016_v11 }
 0x2f2   :  { %vm1243_vm7 = vcmp.gt.f32.partialorder %v1120_v6, 0.0  ;;  %v1263_v17 = vmul.f32 0.01, %v1120_v6  ;;  %v1215_v18 = vadd.f32 %v1214_v14, %v1016_v11  ;;  %v1216_v19 = vpop.f32.mrb[41].mxu1 }
 0x2f3   :  { %v1264_v10 = vmul.f32 0.01, %v1122_v15  ;;  %v1217_v21 = vadd.f32 %v1216_v19, %v1016_v11  ;;  %v1125_v24 = vpop.f32.mrb[42].mxu0  ;;  %vm1244_vm9 = vcmp.gt.f32.partialorder %v1122_v15, 0.0 }
 0x2f4   :  { %vm1245_vm8 = vcmp.gt.f32.partialorder %v1215_v18, 0.0  ;;  %v1265_v26 = vmul.f32 0.01, %v1215_v18  ;;  %v1126_v27 = vadd.f32 %v1125_v24, %v1021_v20  ;;  %v1127_v28 = vpop.f32.mrb[43].mxu0  ;;  %v2522_v31 = vsel %vm1243_vm7, %v1120_v6, %v1263_v17  ;;  %v1036_v6 = vpop.permute.xlu0 %1035 }
 0x2f5   :  { %v1266_v25 = vmul.f32 0.01, %v1217_v21  ;;  %v1220_v34 = vpop.f32.mrb[42].mxu1  ;;  %v1128_v22 = vadd.f32 %v1127_v28, %v1021_v20  ;;  %vm1246_vm12 = vcmp.gt.f32.partialorder %v1217_v21, 0.0  ;;  %v1284_v16 = vsel %vm1244_vm9, %v1122_v15, %v1264_v10 }
 0x2f6   :  { %vm1247_vm10 = vcmp.gt.f32.partialorder %v1126_v27, 0.0  ;;  %v1267_v35 = vmul.f32 0.01, %v1126_v27  ;;  %v1221_v37 = vadd.f32 %v1220_v34, %v1021_v20  ;;  %v1222_v38 = vpop.f32.mrb[43].mxu1  ;;  %v2524_v41 = vsel %vm1245_vm8, %v1215_v18, %v1265_v26 }
 0x2f7   :  { %vm1248_vm11 = vcmp.gt.f32.partialorder %v1128_v22, 0.0  ;;  %v1223_v43 = vadd.f32 %v1222_v38, %v1021_v20  ;;  %v1131_v44 = vpop.f32.mrb[44].mxu0  ;;  %v1268_v46 = vmul.f32 0.01, %v1128_v22  ;;  %v1286_v53 = vsel %vm1246_vm12, %v1217_v21, %v1266_v25 }
 0x2f8   :  { %v1287_v29 = vsel %vm1247_vm10, %v1126_v27, %v1267_v35  ;;  %vm1249_vm13 = vcmp.gt.f32.partialorder %v1221_v37, 0.0  ;;  %v1269_v23 = vmul.f32 0.01, %v1221_v37  ;;  %v1132_v39 = vadd.f32 %v1131_v44, %v1026_v40  ;;  %v1133_v32 = vpop.f32.mrb[45].mxu0 }
 0x2f9   :  { %v1904_v45 = vpack.c.bf16 %v1287_v29, %v2522_v31  ;;  %v1226_v33 = vpop.f32.mrb[44].mxu1  ;;  %v1134_v51 = vadd.f32 %v1133_v32, %v1026_v40  ;;  %vm1250_vm15 = vcmp.gt.f32.partialorder %v1223_v43, 0.0  ;;  %v1270_v48 = vmul.f32 0.01, %v1223_v43  ;;  %v1303_v29 = vld [vmem:[%s2580_s7] sm:$0xff]  ;;  %v1304_v32 = vld [vmem:[%s2580_s7 + $0x8] sm:$0xff] }
 0x2fa   :  { %v1289_v30 = vsel %vm1249_vm13, %v1221_v37, %v1269_v23  ;;  %vm1251_vm14 = vcmp.gt.f32.partialorder %v1132_v39, 0.0  ;;  %v1271_v36 = vmul.f32 0.01, %v1132_v39  ;;  %v1227_v50 = vadd.f32 %v1226_v33, %v1026_v40  ;;  %v1228_v54 = vpop.f32.mrb[45].mxu1 }
 0x2fb   :  { %v1912_v49 = vpack.c.bf16 %v1289_v30, %v2524_v41  ;;  %v1229_v52 = vadd.f32 %v1228_v54, %v1026_v40  ;;  %v1137_v47 = vpop.f32.mrb[46].mxu0  ;;  %vm1252_vm0 = vcmp.gt.f32.partialorder %v1134_v51, 0.0  ;;  %v1272_v62 = vmul.f32 0.01, %v1134_v51 }
 0x2fc   :  { %v1291_v57 = vsel %vm1251_vm14, %v1132_v39, %v1271_v36  ;;  %v1138_v63 = vadd.f32 %v1137_v47, %v1031_v56  ;;  %v1139_v42 = vpop.f32.mrb[47].mxu0  ;;  %vm1253_vm1 = vcmp.gt.f32.partialorder %v1227_v50, 0.0  ;;  %v1273_v55 = vmul.f32 0.01, %v1227_v50 }
 0x2fd   :  { %v1232_v1 = vpop.f32.mrb[46].mxu1  ;;  %v1140_v59 = vadd.f32 %v1139_v42, %v1031_v56  ;;  %v1288_v2 = vsel %vm1248_vm11, %v1128_v22, %v1268_v46  ;;  %vm1254_vm2 = vcmp.gt.f32.partialorder %v1229_v52, 0.0  ;;  %v1290_v11 = vsel %vm1250_vm15, %v1223_v43, %v1270_v48  ;;  %v1312_v46 = vpop.permute.xlu1 %1311 }
 0x2fe   :  { %vm1255_vm3 = vcmp.gt.f32.partialorder %v1138_v63, 0.0  ;;  %v1275_v0 = vmul.f32 0.01, %v1138_v63  ;;  %v1233_v58 = vadd.f32 %v1232_v1, %v1031_v56  ;;  %v1234_v61 = vpop.f32.mrb[47].mxu1  ;;  %v1902_v5 = vpack.c.bf16 %v1288_v2, %v1284_v16 }
 0x2ff   :  { %vm1256_vm4 = vcmp.gt.f32.partialorder %v1140_v59, 0.0  ;;  %v1276_v4 = vmul.f32 0.01, %v1140_v59  ;;  %v1235_v60 = vadd.f32 %v1234_v61, %v1031_v56  ;;  %v1143_v7 = vpop.f32.mrb[48].mxu0  ;;  %v1293_v13 = vsel %vm1253_vm1, %v1227_v50, %v1273_v55 }
 0x300   :  { %v1295_v8 = vsel %vm1255_vm3, %v1138_v63, %v1275_v0  ;;  %vm1257_vm5 = vcmp.gt.f32.partialorder %v1233_v58, 0.0  ;;  %v1277_v9 = vmul.f32 0.01, %v1233_v58  ;;  %v1145_v12 = vpop.f32.mrb[49].mxu0  ;;  %v1274_v14 = vmul.f32 0.01, %v1229_v52  ;;  %1903 = vmatprep.subr.bf16.mxu0 %v1902_v5 }
 0x301   :  { %v1908_v15 = vpack.c.bf16 %v1295_v8, %v1291_v57  ;;  %v1910_v17 = vpack.c.bf16 %v1290_v11, %v1286_v53  ;;  %v1238_v18 = vpop.f32.mrb[48].mxu1  ;;  %vm1258_vm6 = vcmp.gt.f32.partialorder %v1235_v60, 0.0  ;;  %v1278_v20 = vmul.f32 0.01, %v1235_v60  ;;  %1905 = vmatpush1.bf16.msra.mxu0 %v1904_v45  ;;  %v1305_v45 = vld [vmem:[%s2580_s7 + $0x10] sm:$0xf] }
 0x302   :  { %v1297_v19 = vsel %vm1257_vm5, %v1233_v58, %v1277_v9  ;;  %v1146_v10 = vadd.f32 %v1145_v12, %v1036_v6  ;;  %v1240_v21 = vpop.f32.mrb[49].mxu1  ;;  %v1144_v26 = vadd.f32 %v1143_v7, %v1036_v6  ;;  %v1296_v28 = vsel %vm1256_vm4, %v1140_v59, %v1276_v4  ;;  %v1322_v4 = vpop.permute.xlu1 %1321 }
 0x303   :  { %v1916_v24 = vpack.c.bf16 %v1297_v19, %v1293_v13  ;;  %1911 = vmatprep.subr.bf16.mxu1 %v1910_v17  ;;  %v1241_v27 = vadd.f32 %v1240_v21, %v1036_v6  ;;  %v1292_v31 = vsel %vm1252_vm0, %v1134_v51, %v1272_v62  ;;  %v1239_v25 = vadd.f32 %v1238_v18, %v1036_v6 }
 0x304   :  { %1913 = vmatpush1.bf16.msra.mxu1 %v1912_v49  ;;  %v1280_v34 = vmul.f32 0.01, %v1146_v10  ;;  %v1906_v35 = vpack.c.bf16 %v1296_v28, %v1292_v31  ;;  %v1294_v37 = vsel %vm1254_vm2, %v1229_v52, %v1274_v14  ;;  %v1298_v38 = vsel %vm1258_vm6, %v1235_v60, %v1278_v20  ;;  %v1317_v49 = vpop.permute.xlu0 %1316 }
 0x305   :  { %v1282_v22 = vmul.f32 0.01, %v1241_v27  ;;  %vm1260_vm7 = vcmp.gt.f32.partialorder %v1146_v10, 0.0  ;;  %vm1262_vm8 = vcmp.gt.f32.partialorder %v1241_v27, 0.0  ;;  %v1279_v40 = vmul.f32 0.01, %v1144_v26 }
 0x306   :  { %1907 = vmatprep.subr.bf16.mxu0 %v1906_v35  ;;  %v1914_v41 = vpack.c.bf16 %v1298_v38, %v1294_v37  ;;  %v1300_v43 = vsel %vm1260_vm7, %v1146_v10, %v1280_v34  ;;  %vm1259_vm9 = vcmp.gt.f32.partialorder %v1144_v26, 0.0  ;;  %v1281_v16 = vmul.f32 0.01, %v1239_v25  ;;  %v1536_v38 = vld [vmem:[%s2581_s9] sm:$0x1] }
 0x307   :  { %1909 = vmatpush1.bf16.msra.mxu0 %v1908_v15  ;;  %v1302_v44 = vsel %vm1262_vm8, %v1241_v27, %v1282_v22  ;;  %vm1261_vm12 = vcmp.gt.f32.partialorder %v1239_v25, 0.0  ;;  %vm1324_vm10 = vcmask 326656   ;;  %v1299_v23 = vsel %vm1259_vm9, %v1144_v26, %v1279_v40 }
 0x308   :  { %1915 = vmatprep.subr.bf16.mxu1 %v1914_v41  ;;  %1342 = vmatprep.subr.mxu0 %v1300_v43  ;;  %v1301_v39 = vsel %vm1261_vm12, %v1239_v25, %v1281_v16  ;;  %vm1551_vm6 = vcmask 1043456   ;;  %vm1547_vm9 = vcmask 162816   ;;  %v1543_v43 = vlaneseq }
 0x309   :  { %1917 = vmatpush1.bf16.msra.mxu1 %v1916_v24  ;;  %v1935_v16 = vmov 1966171168  }
 0x30a   :  { %1425 = vmatprep.subr.mxu1 %v1302_v44  ;;  %v1544_v44 = vshrl.u32 %v1543_v43, 7  ;;  %vm1737_vm12 = vcmp.lt.s32.totalorder %v1543_v43, 512 }
 0x30b   :  { %1343 = vmatpush1.msra.mxu0 %v1299_v23 }
 0x30c   :  { %1798 = vmatmul.mubr.msk.f32.vlgmr.msra.gmra.mrb[50].mxu0 %vm1324_vm10, %v1303_v29  ;;  %v1545_v23 = vsub.s32 0, %v1544_v44 }
 0x30d   :  { %1426 = vmatpush1.msra.mxu1 %v1301_v39  ;;  %1404 = vmatprep.mubr.f32.mxu0 %v1933_v3  ;;  %v1541_v39 = vpop.permute.xlu0 %1540 }
 0x30e   :  { %1801 = vmatmul.mubr.msk.f32.vlgmr.msra.gmra.mrb[50].mxu1 %vm1324_vm10, %v1303_v29  ;;  %v1713_v29 = vunpack.c.l.s4 %v1935_v16 }
 0x30f   :  { %1487 = vmatprep.mubr.f32.mxu1 %v1933_v3 }
 0x310   :  { %1799 = vmatmul.mubr.msk.f32.gmra.mrb[52].mxu0 %vm1324_vm10, %v1304_v32 }
 0x311   :  { %1410 = vmatprep.mubr.f32.mxu0 %v1933_v3 }
 0x312   :  { %1802 = vmatmul.mubr.msk.f32.gmra.mrb[52].mxu1 %vm1324_vm10, %v1304_v32  ;;  %v1714_v32 = vunpack.c.0.s8 %v1713_v29 }
 0x313   :  { %1493 = vmatprep.mubr.f32.mxu1 %v1933_v3 }
 0x314   :  { %1800 = vmatmul.mubr.msk.f32.gmra.mrb[54].mxu0 %vm1324_vm10, %v1305_v45 }
 0x315   :  { %1628 = vmatprep.mubr.f32.mxu0 %v1933_v3 }
 0x316   :  { %1803 = vmatmul.mubr.msk.f32.gmra.mrb[54].mxu1 %vm1324_vm10, %v1305_v45  ;;  %v1546_v45 = vrot.slane %v1541_v39, %v1545_v23 }
 0x317   :  { %1699 = vmatprep.mubr.f32.mxu1 %v1933_v3 }
 0x3df   :  { %v1400_v33 = vpop.f32.mrb[50].mxu0 }
 0x3e0   :  { %v1401_v51 = vadd.f32 %v1400_v33, %v1312_v46  ;;  %v1402_v53 = vpop.f32.mrb[51].mxu0 }
 0x3e1   :  { %v1483_v30 = vpop.f32.mrb[50].mxu1  ;;  %v1403_v36 = vadd.f32 %v1402_v53, %v1312_v46 }
 0x3e2   :  { %vm1500_vm11 = vcmp.gt.f32.partialorder %v1401_v51, 0.0  ;;  %v1512_v50 = vmul.f32 0.01, %v1401_v51  ;;  %v1484_v54 = vadd.f32 %v1483_v30, %v1312_v46  ;;  %v1485_v56 = vpop.f32.mrb[51].mxu1  ;;  %v1717_v30 = vsub.s32 %v1714_v32, %v1544_v44 }
 0x3e3   :  { %v1486_v48 = vadd.f32 %v1485_v56, %v1312_v46  ;;  %v1406_v52 = vpop.f32.mrb[52].mxu0  ;;  %vm1501_vm13 = vcmp.gt.f32.partialorder %v1403_v36, 0.0  ;;  %v1513_v63 = vmul.f32 0.01, %v1403_v36 }
 0x3e4   :  { %v1407_v47 = vadd.f32 %v1406_v52, %v1317_v49  ;;  %v1408_v57 = vpop.f32.mrb[53].mxu0  ;;  %v1524_v62 = vsel %vm1500_vm11, %v1401_v51, %v1512_v50  ;;  %v1514_v55 = vmul.f32 0.01, %v1484_v54  ;;  %vm1502_vm15 = vcmp.gt.f32.partialorder %v1484_v54, 0.0 }
 0x3e5   :  { %v1489_v42 = vpop.f32.mrb[52].mxu1  ;;  %v1409_v3 = vadd.f32 %v1408_v57, %v1317_v49  ;;  %vm1503_vm0 = vcmp.gt.f32.partialorder %v1486_v48, 0.0  ;;  %v1515_v0 = vmul.f32 0.01, %v1486_v48  ;;  %v1525_v21 = vsel %vm1501_vm13, %v1403_v36, %v1513_v63 }
 0x3e6   :  { %vm1504_vm14 = vcmp.gt.f32.partialorder %v1407_v47, 0.0  ;;  %v1516_v1 = vmul.f32 0.01, %v1407_v47  ;;  %v1490_v59 = vadd.f32 %v1489_v42, %v1317_v49  ;;  %v1491_v2 = vpop.f32.mrb[53].mxu1  ;;  %v1526_v13 = vsel %vm1502_vm15, %v1484_v54, %v1514_v55 }
 0x3e7   :  { %v1492_v58 = vadd.f32 %v1491_v2, %v1317_v49  ;;  %v1412_v61 = vpop.f32.mrb[54].mxu0  ;;  %v1517_v7 = vmul.f32 0.01, %v1409_v3  ;;  %vm1505_vm2 = vcmp.gt.f32.partialorder %v1409_v3, 0.0  ;;  %v1527_v26 = vsel %vm1503_vm0, %v1486_v48, %v1515_v0 }
 0x3e8   :  { %v1528_v60 = vsel %vm1504_vm14, %v1407_v47, %v1516_v1  ;;  %vm1506_vm1 = vcmp.gt.f32.partialorder %v1490_v59, 0.0  ;;  %v1518_v5 = vmul.f32 0.01, %v1490_v59  ;;  %v1414_v8 = vpop.f32.mrb[55].mxu0  ;;  %v1413_v15 = vadd.f32 %v1412_v61, %v1322_v4 }
 0x3e9   :  { %v1920_v9 = vpack.c.bf16 %v1528_v60, %v1524_v62  ;;  %v1519_v11 = vmul.f32 0.01, %v1492_v58  ;;  %v1495_v12 = vpop.f32.mrb[54].mxu1  ;;  %v1415_v6 = vadd.f32 %v1414_v8, %v1322_v4  ;;  %vm1507_vm3 = vcmp.gt.f32.partialorder %v1492_v58, 0.0 }
 0x3ea   :  { %v1530_v14 = vsel %vm1506_vm1, %v1490_v59, %v1518_v5  ;;  %v1497_v17 = vpop.f32.mrb[55].mxu1  ;;  %v1496_v10 = vadd.f32 %v1495_v12, %v1322_v4  ;;  %v1529_v24 = vsel %vm1505_vm2, %v1409_v3, %v1517_v7  ;;  %v1520_v22 = vmul.f32 0.01, %v1413_v15 }
 0x3eb   :  { %v1924_v18 = vpack.c.bf16 %v1530_v14, %v1526_v13  ;;  %vm1509_vm4 = vcmp.gt.f32.partialorder %v1415_v6, 0.0  ;;  %v1521_v19 = vmul.f32 0.01, %v1415_v6  ;;  %v1498_v20 = vadd.f32 %v1497_v17, %v1322_v4 }
 0x3ec   :  { %v1918_v28 = vpack.c.bf16 %v1529_v24, %v1525_v21  ;;  %v1531_v31 = vsel %vm1507_vm3, %v1492_v58, %v1519_v11  ;;  %vm1508_vm7 = vcmp.gt.f32.partialorder %v1413_v15, 0.0  ;;  %v1522_v37 = vmul.f32 0.01, %v1496_v10 }
 0x3ed   :  { %vm1511_vm5 = vcmp.gt.f32.partialorder %v1498_v20, 0.0  ;;  %v1523_v27 = vmul.f32 0.01, %v1498_v20  ;;  %v1922_v25 = vpack.c.bf16 %v1531_v31, %v1527_v26  ;;  %v1533_v34 = vsel %vm1509_vm4, %v1415_v6, %v1521_v19 }
 0x3ee   :  { %1919 = vmatprep.subr.bf16.mxu0 %v1918_v28  ;;  %vm1510_vm8 = vcmp.gt.f32.partialorder %v1496_v10, 0.0  ;;  %v1532_v40 = vsel %vm1508_vm7, %v1413_v15, %v1520_v22 }
 0x3ef   :  { %v1535_v35 = vsel %vm1511_vm5, %v1498_v20, %v1523_v27  ;;  %1923 = vmatprep.subr.bf16.mxu1 %v1922_v25  ;;  %1921 = vmatpush1.bf16.msra.mxu0 %v1920_v9  ;;  %v1534_v41 = vsel %vm1510_vm8, %v1496_v10, %v1522_v37 }
 0x3f0   :  { %1925 = vmatpush1.bf16.msra.mxu1 %v1924_v18  ;;  %1804 = vmatprep.subr.msk.mxu0 %vm1551_vm6, %v1533_v34 }
 0x3f1   :  { %1807 = vmatprep.subr.msk.mxu1 %vm1551_vm6, %v1535_v35 }
 0x3f3   :  { %1805 = vmatpush1.msk.msra.mxu0 %vm1551_vm6, %v1532_v40 }
 0x3f4   :  { %1808 = vmatpush1.msk.msra.mxu1 %vm1551_vm6, %v1534_v41  ;;  %1806 = vmatmul.mubr.msk.f32.vlgmr.msra.gmra.mrb[56].mxu0 %vm1547_vm9, %v1536_v38 }
 0x3f5   :  { %1809 = vmatmul.mubr.msk.f32.vlgmr.msra.gmra.mrb[56].mxu1 %vm1547_vm9, %v1536_v38 }
 0x4c7   :  { %v1630_v46 = vpop.f32.mrb[56].mxu0 }
 0x4c8   :  { %v1631_v33 = vadd.f32 %v1630_v46, %v1546_v45  ;;  %v1701_v51 = vpop.f32.mrb[56].mxu1  ;;  %v1632_v53 = vpop.f32.mrb[57].mxu0 }
 0x4c9   :  { %v1702_v36 = vadd.f32 %v1701_v51, %v1546_v45  ;;  %v1633_v50 = vadd.f32 %v1632_v53, %v1546_v45  ;;  %v1703_v54 = vpop.f32.mrb[57].mxu1 }
 0x4ca   :  { %v1704_v56 = vadd.f32 %v1703_v54, %v1546_v45 }
 0x4cb   :  { %v1710_v49 = vcombine.low %v1631_v33, %v1633_v50 }
 0x4cc   :  { %v1711_v48 = vcombine.low %v1702_v36, %v1704_v56 }
 0x4cd   :  { %v1718_v52 = vrot.slane %v1710_v49, %v1717_v30 }
 0x4ce   :  { %v1725_v47 = vrot.slane %v1711_v48, %v1717_v30 }
 0x4d0   :  { %v1726_v57 = vcombine.low %v1718_v52, %v1725_v47 }
 0x4d2   :  { %v1733_v62 = vrot.slane %v1726_v57, %v1717_v30 }
 0x4d4   :  { %1739 = vst.msk [vmem:[%s2582_s11] sm:$0xf] %vm1737_vm12, %v1733_v62 }

</bundles_post_ra>
